<compile_context>
chip_gen: v7x
topology: tpu7x:2x2x1
jax: 0.10.0
libtpu: 0.0.40
codegen_flags: <defaults>
</compile_context>

<pallas_src>
import functools
import math

import jax
import jax.numpy as jnp
from jax.experimental import pallas as pl
from jax.experimental.pallas import tpu as pltpu


# ---------------------------------------------------------------------------
# Multi-head self-attention (+ fused residual)
# ---------------------------------------------------------------------------
def _mha_kernel(x_ref, mask_ref, gamma_ref, beta_ref,
                wq_ref, bq_ref, wk_ref, bk_ref, wv_ref, bv_ref,
                wo_ref, bo_ref, o_ref, *,
                eps, n_heads, n_gqa_groups, d_queries, d_values):
    pdtype = x_ref.dtype
    x_f32 = x_ref[...].astype(jnp.float32)                      # (t, D)

    # LayerNorm: stats in f32, scale/shift folded in stored dtype.
    mean = jnp.mean(x_f32, axis=-1, keepdims=True)
    xc = x_f32 - mean
    var = jnp.mean(xc * xc, axis=-1, keepdims=True)
    xn = ((xc * jax.lax.rsqrt(var + eps)).astype(pdtype)
          * gamma_ref[...] + beta_ref[...]).astype(pdtype)

    # Q/K/V projections: stored-dtype operands, f32 MXU accumulation.
    q = jnp.dot(xn, wq_ref[...], preferred_element_type=jnp.float32) \
        + bq_ref[...].astype(jnp.float32)
    k = jnp.dot(xn, wk_ref[...], preferred_element_type=jnp.float32) \
        + bk_ref[...].astype(jnp.float32)
    v = jnp.dot(xn, wv_ref[...], preferred_element_type=jnp.float32) \
        + bv_ref[...].astype(jnp.float32)

    H, G = n_heads, n_gqa_groups
    dq, dv = d_queries, d_values
    dk = dq
    # The reference einsum '...ghtq,...hTq->...htT' sums logits over the GQA group
    # axis, which equals attention with group-summed query projections.
    if G > 1:
        hdq = H * dq
        q = sum(q[:, g * hdq:(g + 1) * hdq] for g in range(G))

    q = q.astype(pdtype)
    k = k.astype(pdtype)
    v = v.astype(pdtype)

    pad_bool = mask_ref[...] != 0                                # (1, T), True = pad
    scale = 1.0 / math.sqrt(dq)
    wo = wo_ref[...]                                             # (H*dv, D)

    t = x_ref.shape[0]
    d_model = x_ref.shape[1]
    y = jnp.zeros((t, d_model), jnp.float32)
    for h in range(H):                                           # static unroll
        qh = q[:, h * dq:(h + 1) * dq]
        kh = k[:, h * dk:(h + 1) * dk]
        vh = v[:, h * dv:(h + 1) * dv]
        # q @ k^T without materializing a transpose.
        aw = jax.lax.dot_general(qh, kh, (((1,), (1,)), ((), ())),
                                 preferred_element_type=jnp.float32) * scale
        aw = 30.0 * jnp.tanh(aw * (1.0 / 30.0))
        aw = jnp.where(pad_bool, -jnp.inf, aw)                   # key padding mask
        aw = aw - jnp.max(aw, axis=-1, keepdims=True)
        p = jnp.exp(aw)
        p = p / jnp.sum(p, axis=-1, keepdims=True)
        # TODO(synk): training-mode dropout on attention weights not implemented.
        ctx = jnp.dot(p.astype(pdtype), vh, preferred_element_type=jnp.float32)
        # Fold the output projection per head.
        y = y + jnp.dot(ctx.astype(pdtype), wo[h * dv:(h + 1) * dv, :],
                        preferred_element_type=jnp.float32)

    y = y + bo_ref[...].astype(jnp.float32)
    # Fused residual (EncoderLayer.self_attn_residual = Sum()).
    o_ref[...] = (x_f32 + y).astype(o_ref.dtype)


def mha_self_attention_block(x, key_padding_mask, params, *,
                             eps, n_heads, n_gqa_groups, d_queries, d_values):
    """x: (N, t, D); key_padding_mask: (N, t) bool (True = pad). Returns x + MHA(LN(x))."""
    N, t, D = x.shape
    Hq = n_gqa_groups * n_heads * d_queries
    Hk = n_heads * d_queries
    Hv = n_heads * d_values

    mask = key_padding_mask.astype(jnp.int32).reshape(N, 1, t)
    gamma = params["attn_gamma"].reshape(1, D)
    beta = params["attn_beta"].reshape(1, D)
    bq = params["bq"].reshape(1, Hq)
    bk = params["bk"].reshape(1, Hk)
    bv = params["bv"].reshape(1, Hv)
    bo = params["bo"].reshape(1, D)

    kernel = functools.partial(_mha_kernel, eps=eps, n_heads=n_heads,
                               n_gqa_groups=n_gqa_groups,
                               d_queries=d_queries, d_values=d_values)

    return pl.pallas_call(
        kernel,
        out_shape=jax.ShapeDtypeStruct((N, t, D), x.dtype),
        grid_spec=pltpu.PrefetchScalarGridSpec(
            num_scalar_prefetch=0,
            grid=(N,),
            in_specs=[
                pl.BlockSpec((None, t, D), lambda b: (b, 0, 0)),     # x
                pl.BlockSpec((None, 1, t), lambda b: (b, 0, 0)),     # pad mask
                pl.BlockSpec((1, D), lambda b: (0, 0)),              # gamma
                pl.BlockSpec((1, D), lambda b: (0, 0)),              # beta
                pl.BlockSpec((D, Hq), lambda b: (0, 0)),             # Wq
                pl.BlockSpec((1, Hq), lambda b: (0, 0)),             # bq
                pl.BlockSpec((D, Hk), lambda b: (0, 0)),             # Wk
                pl.BlockSpec((1, Hk), lambda b: (0, 0)),             # bk
                pl.BlockSpec((D, Hv), lambda b: (0, 0)),             # Wv
                pl.BlockSpec((1, Hv), lambda b: (0, 0)),             # bv
                pl.BlockSpec((Hv, D), lambda b: (0, 0)),             # Wo
                pl.BlockSpec((1, D), lambda b: (0, 0)),              # bo
            ],
            out_specs=pl.BlockSpec((None, t, D), lambda b: (b, 0, 0)),
        ),
        compiler_params=pltpu.CompilerParams(
            dimension_semantics=("parallel",),
            vmem_limit_bytes=64 * 1024 * 1024),
    )(x, mask, gamma, beta,
      params["wq"], bq, params["wk"], bk, params["wv"], bv,
      params["wo"], bo)


# ---------------------------------------------------------------------------
# PositionWiseFCNetwork (+ fused residual), row-tiled and d_inner-tiled
# ---------------------------------------------------------------------------
def _ffn_kernel(x_ref, gamma_ref, beta_ref, w1_ref, b1_ref, w2_ref, b2_ref,
                o_ref, xn_ref, acc_ref, *, eps):
    k = pl.program_id(1)
    nk = pl.num_programs(1)

    @pl.when(k == 0)
    def _():
        x = x_ref[...].astype(jnp.float32)
        mean = jnp.mean(x, axis=-1, keepdims=True)
        xc = x - mean
        var = jnp.mean(xc * xc, axis=-1, keepdims=True)
        xn = ((xc * jax.lax.rsqrt(var + eps)).astype(xn_ref.dtype)
              * gamma_ref[...] + beta_ref[...])
        xn_ref[...] = xn.astype(xn_ref.dtype)
        acc_ref[...] = jnp.zeros_like(acc_ref)

    # expand slice of d_inner (stored-dtype weights, f32 accumulate) -> ReLU
    h = jnp.dot(xn_ref[...], w1_ref[...], preferred_element_type=jnp.float32)
    h = jnp.maximum(h + b1_ref[...].astype(jnp.float32), 0.0)
    # TODO(synk): training-mode dropout not implemented (identity in eval mode).
    # partial condense, accumulated over the d_inner grid axis
    acc_ref[...] += jnp.dot(h.astype(w2_ref.dtype), w2_ref[...],
                            preferred_element_type=jnp.float32)

    @pl.when(k == nk - 1)
    def _():
        y = acc_ref[...] + b2_ref[...].astype(jnp.float32)
        # Fused residual (EncoderLayer.fcn_residual = Sum()).
        o_ref[...] = (x_ref[...].astype(jnp.float32) + y).astype(o_ref.dtype)


def _round_up(a, b):
    return (a + b - 1) // b * b


def ffn_block(x, params, *, eps, row_tile=256, inner_tile=512):
    """x: (N, P, D). Returns (x + PositionWiseFCNetwork(x), gating_variances=None)."""
    N, P, D = x.shape
    w1, w2 = params["w1"], params["w2"]
    Di = w1.shape[1]
    rows = N * P

    # Row tiling: big lane/sublane-dense tiles; tail handled by zero-padding.
    tr = _round_up(min(row_tile, _round_up(rows, 8)), 8)
    rows_pad = _round_up(rows, tr)

    # d_inner (K) tiling: bounds VMEM regardless of d_inner.
    tk = min(inner_tile, Di)
    if tk != Di and (Di % tk != 0 or tk % 128 != 0):
        tk = Di
    nk = Di // tk

    x_flat = x.reshape(rows, D)
    if rows_pad != rows:
        x_flat = jnp.pad(x_flat, ((0, rows_pad - rows), (0, 0)))

    gamma = params["fcn_gamma"].reshape(1, D)
    beta = params["fcn_beta"].reshape(1, D)
    b1 = params["b1"].reshape(1, Di)
    b2 = params["b2"].reshape(1, D)

    out_flat = pl.pallas_call(
        functools.partial(_ffn_kernel, eps=eps),
        out_shape=jax.ShapeDtypeStruct((rows_pad, D), x.dtype),
        grid_spec=pltpu.PrefetchScalarGridSpec(
            num_scalar_prefetch=0,
            grid=(rows_pad // tr, nk),
            in_specs=[
                pl.BlockSpec((tr, D), lambda i, k: (i, 0)),    # x rows (resident over k)
                pl.BlockSpec((1, D), lambda i, k: (0, 0)),     # gamma
                pl.BlockSpec((1, D), lambda i, k: (0, 0)),     # beta
                pl.BlockSpec((D, tk), lambda i, k: (0, k)),    # W1 column slab
                pl.BlockSpec((1, tk), lambda i, k: (0, k)),    # b1 slab
                pl.BlockSpec((tk, D), lambda i, k: (k, 0)),    # W2 row slab
                pl.BlockSpec((1, D), lambda i, k: (0, 0)),     # b2
            ],
            out_specs=pl.BlockSpec((tr, D), lambda i, k: (i, 0)),
            scratch_shapes=[
                pltpu.VMEM((tr, D), x.dtype),        # LayerNorm output cache
                pltpu.VMEM((tr, D), jnp.float32),    # condense accumulator
            ],
        ),
        compiler_params=pltpu.CompilerParams(
            dimension_semantics=("parallel", "arbitrary"),
            vmem_limit_bytes=64 * 1024 * 1024),
    )(x_flat, gamma, beta, w1, b1, w2, b2)

    out = out_flat[:rows].reshape(N, P, D)
    return out, None   # non-MoE path -> gating_variances is None


# ---------------------------------------------------------------------------
# EncoderLayer forward
# ---------------------------------------------------------------------------
def encoder_layer_forward(encoder_sequences, key_padding_mask, params, *,
                          eps=1e-6, n_heads=4, n_gqa_groups=1,
                          d_queries=32, d_values=32,
                          row_tile=256, inner_tile=512):
    x = mha_self_attention_block(
        encoder_sequences, key_padding_mask, params, eps=eps,
        n_heads=n_heads, n_gqa_groups=n_gqa_groups,
        d_queries=d_queries, d_values=d_values)
    out, gating_variances = ffn_block(
        x, params, eps=eps, row_tile=row_tile, inner_tile=inner_tile)
    return out, gating_variances


# ---------------------------------------------------------------------------
# Pure-JAX reference (mirrors the PyTorch forward, eval mode)
# ---------------------------------------------------------------------------
def _reference_encoder_layer(x, pad_mask, params, *, eps, n_heads, n_gqa_groups,
                             d_queries, d_values):
    N, t, D = x.shape
    H, G, dq, dv = n_heads, n_gqa_groups, d_queries, d_values
    dk = dq

    def layer_norm(v, g, b):
        v32 = v.astype(jnp.float32)
        mu = jnp.mean(v32, -1, keepdims=True)
        var = jnp.mean((v32 - mu) ** 2, -1, keepdims=True)
        return (v32 - mu) * jax.lax.rsqrt(var + eps) * g + b

    xn = layer_norm(x, params["attn_gamma"], params["attn_beta"])
    q = xn @ params["wq"] + params["bq"]
    k = xn @ params["wk"] + params["bk"]
    v = xn @ params["wv"] + params["bv"]
    q = q.reshape(N, t, G, H, dq).transpose(0, 2, 3, 1, 4)   # (N,G,H,t,dq)
    k = k.reshape(N, t, H, dk).transpose(0, 2, 1, 3)          # (N,H,T,dk)
    v = v.reshape(N, t, H, dv).transpose(0, 2, 1, 3)          # (N,H,T,dv)
    aw = jnp.einsum('nghtq,nhTq->nhtT', q, k) / math.sqrt(dq)
    aw = 30.0 * jnp.tanh(aw / 30.0)
    aw = jnp.where(pad_mask[:, None, None, :], -jnp.inf, aw)
    aw = jax.nn.softmax(aw, axis=-1)
    ctx = jnp.einsum('nhtT,nhTv->nhtv', aw, v)
    ctx = ctx.transpose(0, 2, 1, 3).reshape(N, t, H * dv)
    attn = ctx @ params["wo"] + params["bo"]
    x1 = x + attn

    xn2 = layer_norm(x1, params["fcn_gamma"], params["fcn_beta"])
    h = jnp.maximum(xn2 @ params["w1"] + params["b1"], 0.0)
    f = h @ params["w2"] + params["b2"]
    return x1 + f


if __name__ == "__main__":
    # Small but lane-dense shapes consistent with the module:
    #   batch N=2, positions t=8, d_model=128, 4 heads x 32, d_inner=256.
    N, t = 2, 8
    d_model, d_inner = 128, 256
    n_heads, n_gqa_groups = 4, 1
    d_queries = d_values = 32
    eps = 1e-6

    key = jax.random.PRNGKey(0)
    ks = jax.random.split(key, 8)

    def xavier(k, shape):
        lim = math.sqrt(6.0 / (shape[0] + shape[1]))
        return jax.random.uniform(k, shape, minval=-lim, maxval=lim,
                                  dtype=jnp.float32)

    Hq = n_gqa_groups * n_heads * d_queries
    Hk = n_heads * d_queries
    Hv = n_heads * d_values

    x = jax.random.normal(ks[0], (N, t, d_model), dtype=jnp.float32)
    params = {
        "attn_gamma": jnp.ones((d_model,), jnp.float32),
        "attn_beta": jnp.zeros((d_model,), jnp.float32),
        "wq": xavier(ks[1], (d_model, Hq)), "bq": jnp.zeros((Hq,), jnp.float32),
        "wk": xavier(ks[2], (d_model, Hk)), "bk": jnp.zeros((Hk,), jnp.float32),
        "wv": xavier(ks[3], (d_model, Hv)), "bv": jnp.zeros((Hv,), jnp.float32),
        "wo": xavier(ks[4], (Hv, d_model)), "bo": jnp.zeros((d_model,), jnp.float32),
        "fcn_gamma": jnp.ones((d_model,), jnp.float32),
        "fcn_beta": jnp.zeros((d_model,), jnp.float32),
        "w1": xavier(ks[5], (d_model, d_inner)),
        "b1": jnp.zeros((d_inner,), jnp.float32),
        "w2": xavier(ks[6], (d_inner, d_model)),
        "b2": jnp.zeros((d_model,), jnp.float32),
    }
    # Key padding mask: True = padded key position (batch 1 has 2 padded slots).
    key_padding_mask = jnp.zeros((N, t), dtype=bool).at[1, 6:].set(True)

    out, gating_variances = encoder_layer_forward(
        x, key_padding_mask, params, eps=eps,
        n_heads=n_heads, n_gqa_groups=n_gqa_groups,
        d_queries=d_queries, d_values=d_values,
        row_tile=256, inner_tile=512)
    out = jax.block_until_ready(out)

    ref = _reference_encoder_layer(
        x, key_padding_mask, params, eps=eps,
        n_heads=n_heads, n_gqa_groups=n_gqa_groups,
        d_queries=d_queries, d_values=d_values)

    assert out.shape == (N, t, d_model)
    assert gating_variances is None
    assert jnp.allclose(out, ref, atol=2e-3, rtol=2e-3), (
        "mismatch vs reference: max abs diff = "
        f"{float(jnp.max(jnp.abs(out - ref)))}")

    print("KERNEL_OK")
</pallas_src>

<mosaic_0001>
module attributes {stable_mosaic.version = 11 : i64} {
  func.func @_mha_kernel(%arg0: i32, %arg1: memref<1x8x128xf32, #tpu.memory_space<vmem>>, %arg2: memref<1x1x8xi32, #tpu.memory_space<vmem>>, %arg3: memref<1x128xf32, #tpu.memory_space<vmem>>, %arg4: memref<1x128xf32, #tpu.memory_space<vmem>>, %arg5: memref<128x128xf32, #tpu.memory_space<vmem>>, %arg6: memref<1x128xf32, #tpu.memory_space<vmem>>, %arg7: memref<128x128xf32, #tpu.memory_space<vmem>>, %arg8: memref<1x128xf32, #tpu.memory_space<vmem>>, %arg9: memref<128x128xf32, #tpu.memory_space<vmem>>, %arg10: memref<1x128xf32, #tpu.memory_space<vmem>>, %arg11: memref<128x128xf32, #tpu.memory_space<vmem>>, %arg12: memref<1x128xf32, #tpu.memory_space<vmem>>, %arg13: memref<1x8x128xf32, #tpu.memory_space<vmem>>) attributes {dimension_semantics = [#tpu.dimension_semantics<parallel>], iteration_bounds = array<i64: 2>, scalar_prefetch = 0 : i64, scratch_operands = 0 : i64, tpu.core_type = #tpu.core_type<tc>, window_params = [{transform_indices = @transform_0, window_bounds = array<i64: 1, 8, 128>}, {transform_indices = @transform_1, window_bounds = array<i64: 1, 1, 8>}, {pipeline_mode = #tpu.pipeline_mode<synchronous>, transform_indices = @transform_2, window_bounds = array<i64: 1, 128>}, {pipeline_mode = #tpu.pipeline_mode<synchronous>, transform_indices = @transform_3, window_bounds = array<i64: 1, 128>}, {pipeline_mode = #tpu.pipeline_mode<synchronous>, transform_indices = @transform_4, window_bounds = array<i64: 128, 128>}, {pipeline_mode = #tpu.pipeline_mode<synchronous>, transform_indices = @transform_5, window_bounds = array<i64: 1, 128>}, {pipeline_mode = #tpu.pipeline_mode<synchronous>, transform_indices = @transform_6, window_bounds = array<i64: 128, 128>}, {pipeline_mode = #tpu.pipeline_mode<synchronous>, transform_indices = @transform_7, window_bounds = array<i64: 1, 128>}, {pipeline_mode = #tpu.pipeline_mode<synchronous>, transform_indices = @transform_8, window_bounds = array<i64: 128, 128>}, {pipeline_mode = #tpu.pipeline_mode<synchronous>, transform_indices = @transform_9, window_bounds = array<i64: 1, 128>}, {pipeline_mode = #tpu.pipeline_mode<synchronous>, transform_indices = @transform_10, window_bounds = array<i64: 128, 128>}, {pipeline_mode = #tpu.pipeline_mode<synchronous>, transform_indices = @transform_11, window_bounds = array<i64: 1, 128>}, {transform_indices = @transform_12, window_bounds = array<i64: 1, 8, 128>}]} {
    %c0 = arith.constant 0 : index
    %c0_0 = arith.constant 0 : index
    %c0_1 = arith.constant 0 : index
    %0 = vector.load %arg1[%c0, %c0_0, %c0_1] : memref<1x8x128xf32, #tpu.memory_space<vmem>>, vector<1x8x128xf32>
    %1 = vector.shape_cast %0 : vector<1x8x128xf32> to vector<8x128xf32>
    %cst = arith.constant dense<0.000000e+00> : vector<8xf32>
    %2 = vector.multi_reduction <add>, %1, %cst [1] : vector<8x128xf32> to vector<8xf32>
    %3 = vector.shape_cast %2 : vector<8xf32> to vector<8x1xf32>
    %cst_2 = arith.constant 1.280000e+02 : f32
    %4 = vector.broadcast %cst_2 : f32 to vector<8x1xf32>
    %5 = arith.divf %3, %4 : vector<8x1xf32>
    %6 = vector.broadcast %5 : vector<8x1xf32> to vector<8x128xf32>
    %7 = arith.subf %1, %6 : vector<8x128xf32>
    %8 = arith.mulf %7, %7 : vector<8x128xf32>
    %cst_3 = arith.constant dense<0.000000e+00> : vector<8xf32>
    %9 = vector.multi_reduction <add>, %8, %cst_3 [1] : vector<8x128xf32> to vector<8xf32>
    %10 = vector.shape_cast %9 : vector<8xf32> to vector<8x1xf32>
    %cst_4 = arith.constant 1.280000e+02 : f32
    %11 = vector.broadcast %cst_4 : f32 to vector<8x1xf32>
    %12 = arith.divf %10, %11 : vector<8x1xf32>
    %cst_5 = arith.constant 9.99999997E-7 : f32
    %13 = vector.broadcast %cst_5 : f32 to vector<8x1xf32>
    %14 = arith.addf %12, %13 : vector<8x1xf32>
    %15 = math.rsqrt %14 : vector<8x1xf32>
    %16 = vector.broadcast %15 : vector<8x1xf32> to vector<8x128xf32>
    %17 = arith.mulf %7, %16 : vector<8x128xf32>
    %c0_6 = arith.constant 0 : index
    %c0_7 = arith.constant 0 : index
    %18 = vector.load %arg3[%c0_6, %c0_7] : memref<1x128xf32, #tpu.memory_space<vmem>>, vector<1x128xf32>
    %19 = vector.broadcast %18 : vector<1x128xf32> to vector<8x128xf32>
    %20 = arith.mulf %17, %19 : vector<8x128xf32>
    %c0_8 = arith.constant 0 : index
    %c0_9 = arith.constant 0 : index
    %21 = vector.load %arg4[%c0_8, %c0_9] : memref<1x128xf32, #tpu.memory_space<vmem>>, vector<1x128xf32>
    %22 = vector.broadcast %21 : vector<1x128xf32> to vector<8x128xf32>
    %23 = arith.addf %20, %22 : vector<8x128xf32>
    %c0_10 = arith.constant 0 : index
    %c0_11 = arith.constant 0 : index
    %24 = vector.load %arg5[%c0_10, %c0_11] : memref<128x128xf32, #tpu.memory_space<vmem>>, vector<128x128xf32>
    %cst_12 = arith.constant dense<0.000000e+00> : vector<8x128xf32>
    %25 = tpu.matmul %23, %24, %cst_12 {dimension_numbers = #tpu.dot_dimension_numbers<[1], [0], [0], [1], [0, 0, 1, 1], [], []>} : vector<8x128xf32>, vector<128x128xf32>, vector<8x128xf32> -> vector<8x128xf32>
    %c0_13 = arith.constant 0 : index
    %c0_14 = arith.constant 0 : index
    %26 = vector.load %arg6[%c0_13, %c0_14] : memref<1x128xf32, #tpu.memory_space<vmem>>, vector<1x128xf32>
    %27 = vector.broadcast %26 : vector<1x128xf32> to vector<8x128xf32>
    %28 = arith.addf %25, %27 : vector<8x128xf32>
    %c0_15 = arith.constant 0 : index
    %c0_16 = arith.constant 0 : index
    %29 = vector.load %arg7[%c0_15, %c0_16] : memref<128x128xf32, #tpu.memory_space<vmem>>, vector<128x128xf32>
    %cst_17 = arith.constant dense<0.000000e+00> : vector<8x128xf32>
    %30 = tpu.matmul %23, %29, %cst_17 {dimension_numbers = #tpu.dot_dimension_numbers<[1], [0], [0], [1], [0, 0, 1, 1], [], []>} : vector<8x128xf32>, vector<128x128xf32>, vector<8x128xf32> -> vector<8x128xf32>
    %c0_18 = arith.constant 0 : index
    %c0_19 = arith.constant 0 : index
    %31 = vector.load %arg8[%c0_18, %c0_19] : memref<1x128xf32, #tpu.memory_space<vmem>>, vector<1x128xf32>
    %32 = vector.broadcast %31 : vector<1x128xf32> to vector<8x128xf32>
    %33 = arith.addf %30, %32 : vector<8x128xf32>
    %c0_20 = arith.constant 0 : index
    %c0_21 = arith.constant 0 : index
    %34 = vector.load %arg9[%c0_20, %c0_21] : memref<128x128xf32, #tpu.memory_space<vmem>>, vector<128x128xf32>
    %cst_22 = arith.constant dense<0.000000e+00> : vector<8x128xf32>
    %35 = tpu.matmul %23, %34, %cst_22 {dimension_numbers = #tpu.dot_dimension_numbers<[1], [0], [0], [1], [0, 0, 1, 1], [], []>} : vector<8x128xf32>, vector<128x128xf32>, vector<8x128xf32> -> vector<8x128xf32>
    %c0_23 = arith.constant 0 : index
    %c0_24 = arith.constant 0 : index
    %36 = vector.load %arg10[%c0_23, %c0_24] : memref<1x128xf32, #tpu.memory_space<vmem>>, vector<1x128xf32>
    %37 = vector.broadcast %36 : vector<1x128xf32> to vector<8x128xf32>
    %38 = arith.addf %35, %37 : vector<8x128xf32>
    %c0_25 = arith.constant 0 : index
    %c0_26 = arith.constant 0 : index
    %c0_27 = arith.constant 0 : index
    %39 = vector.load %arg2[%c0_25, %c0_26, %c0_27] : memref<1x1x8xi32, #tpu.memory_space<vmem>>, vector<1x1x8xi32>
    %40 = vector.shape_cast %39 : vector<1x1x8xi32> to vector<1x8xi32>
    %c0_i32 = arith.constant 0 : i32
    %41 = vector.broadcast %c0_i32 : i32 to vector<1x8xi32>
    %42 = arith.cmpi ne, %40, %41 : vector<1x8xi32>
    %c0_28 = arith.constant 0 : index
    %c0_29 = arith.constant 0 : index
    %43 = vector.load %arg11[%c0_28, %c0_29] : memref<128x128xf32, #tpu.memory_space<vmem>>, vector<128x128xf32>
    %cst_30 = arith.constant 0.000000e+00 : f32
    %44 = vector.broadcast %cst_30 : f32 to vector<8x128xf32>
    %45 = vector.extract_strided_slice %28 {offsets = [0, 0], sizes = [8, 32], strides = [1, 1]} : vector<8x128xf32> to vector<8x32xf32>
    %46 = vector.extract_strided_slice %33 {offsets = [0, 0], sizes = [8, 32], strides = [1, 1]} : vector<8x128xf32> to vector<8x32xf32>
    %47 = vector.extract_strided_slice %38 {offsets = [0, 0], sizes = [8, 32], strides = [1, 1]} : vector<8x128xf32> to vector<8x32xf32>
    %cst_31 = arith.constant dense<0.000000e+00> : vector<8x8xf32>
    %48 = tpu.matmul %45, %46, %cst_31 {dimension_numbers = #tpu.dot_dimension_numbers<[1], [1], [0], [0], [0, 0, 1, 0], [], []>} : vector<8x32xf32>, vector<8x32xf32>, vector<8x8xf32> -> vector<8x8xf32>
    %cst_32 = arith.constant 0.176776692 : f32
    %49 = vector.broadcast %cst_32 : f32 to vector<8x8xf32>
    %50 = arith.mulf %48, %49 : vector<8x8xf32>
    %cst_33 = arith.constant 0.0333333351 : f32
    %51 = vector.broadcast %cst_33 : f32 to vector<8x8xf32>
    %52 = arith.mulf %50, %51 : vector<8x8xf32>
    %53 = math.tanh %52 : vector<8x8xf32>
    %cst_34 = arith.constant 3.000000e+01 : f32
    %54 = vector.broadcast %cst_34 : f32 to vector<8x8xf32>
    %55 = arith.mulf %54, %53 : vector<8x8xf32>
    %cst_35 = arith.constant 0xFF800000 : f32
    %56 = vector.shape_cast %42 : vector<1x8xi1> to vector<1x8xi1>
    %57 = vector.broadcast %56 : vector<1x8xi1> to vector<8x8xi1>
    %58 = vector.broadcast %cst_35 : f32 to vector<8x8xf32>
    %59 = arith.select %57, %58, %55 : vector<8x8xi1>, vector<8x8xf32>
    %cst_36 = arith.constant dense<0xFF800000> : vector<8xf32>
    %60 = vector.multi_reduction <maximumf>, %59, %cst_36 [1] : vector<8x8xf32> to vector<8xf32>
    %61 = vector.shape_cast %60 : vector<8xf32> to vector<8x1xf32>
    %62 = vector.broadcast %61 : vector<8x1xf32> to vector<8x8xf32>
    %63 = arith.subf %59, %62 : vector<8x8xf32>
    %64 = math.exp %63 : vector<8x8xf32>
    %cst_37 = arith.constant dense<0.000000e+00> : vector<8xf32>
    %65 = vector.multi_reduction <add>, %64, %cst_37 [1] : vector<8x8xf32> to vector<8xf32>
    %66 = vector.shape_cast %65 : vector<8xf32> to vector<8x1xf32>
    %67 = vector.broadcast %66 : vector<8x1xf32> to vector<8x8xf32>
    %68 = arith.divf %64, %67 : vector<8x8xf32>
    %cst_38 = arith.constant dense<0.000000e+00> : vector<8x32xf32>
    %69 = tpu.matmul %68, %47, %cst_38 {dimension_numbers = #tpu.dot_dimension_numbers<[1], [0], [0], [1], [0, 0, 1, 1], [], []>} : vector<8x8xf32>, vector<8x32xf32>, vector<8x32xf32> -> vector<8x32xf32>
    %70 = vector.extract_strided_slice %43 {offsets = [0, 0], sizes = [32, 128], strides = [1, 1]} : vector<128x128xf32> to vector<32x128xf32>
    %cst_39 = arith.constant dense<0.000000e+00> : vector<8x128xf32>
    %71 = tpu.matmul %69, %70, %cst_39 {dimension_numbers = #tpu.dot_dimension_numbers<[1], [0], [0], [1], [0, 0, 1, 1], [], []>} : vector<8x32xf32>, vector<32x128xf32>, vector<8x128xf32> -> vector<8x128xf32>
    %72 = arith.addf %44, %71 : vector<8x128xf32>
    %73 = vector.extract_strided_slice %28 {offsets = [0, 32], sizes = [8, 32], strides = [1, 1]} : vector<8x128xf32> to vector<8x32xf32>
    %74 = vector.extract_strided_slice %33 {offsets = [0, 32], sizes = [8, 32], strides = [1, 1]} : vector<8x128xf32> to vector<8x32xf32>
    %75 = vector.extract_strided_slice %38 {offsets = [0, 32], sizes = [8, 32], strides = [1, 1]} : vector<8x128xf32> to vector<8x32xf32>
    %cst_40 = arith.constant dense<0.000000e+00> : vector<8x8xf32>
    %76 = tpu.matmul %73, %74, %cst_40 {dimension_numbers = #tpu.dot_dimension_numbers<[1], [1], [0], [0], [0, 0, 1, 0], [], []>} : vector<8x32xf32>, vector<8x32xf32>, vector<8x8xf32> -> vector<8x8xf32>
    %cst_41 = arith.constant 0.176776692 : f32
    %77 = vector.broadcast %cst_41 : f32 to vector<8x8xf32>
    %78 = arith.mulf %76, %77 : vector<8x8xf32>
    %cst_42 = arith.constant 0.0333333351 : f32
    %79 = vector.broadcast %cst_42 : f32 to vector<8x8xf32>
    %80 = arith.mulf %78, %79 : vector<8x8xf32>
    %81 = math.tanh %80 : vector<8x8xf32>
    %cst_43 = arith.constant 3.000000e+01 : f32
    %82 = vector.broadcast %cst_43 : f32 to vector<8x8xf32>
    %83 = arith.mulf %82, %81 : vector<8x8xf32>
    %cst_44 = arith.constant 0xFF800000 : f32
    %84 = vector.shape_cast %42 : vector<1x8xi1> to vector<1x8xi1>
    %85 = vector.broadcast %84 : vector<1x8xi1> to vector<8x8xi1>
    %86 = vector.broadcast %cst_44 : f32 to vector<8x8xf32>
    %87 = arith.select %85, %86, %83 : vector<8x8xi1>, vector<8x8xf32>
    %cst_45 = arith.constant dense<0xFF800000> : vector<8xf32>
    %88 = vector.multi_reduction <maximumf>, %87, %cst_45 [1] : vector<8x8xf32> to vector<8xf32>
    %89 = vector.shape_cast %88 : vector<8xf32> to vector<8x1xf32>
    %90 = vector.broadcast %89 : vector<8x1xf32> to vector<8x8xf32>
    %91 = arith.subf %87, %90 : vector<8x8xf32>
    %92 = math.exp %91 : vector<8x8xf32>
    %cst_46 = arith.constant dense<0.000000e+00> : vector<8xf32>
    %93 = vector.multi_reduction <add>, %92, %cst_46 [1] : vector<8x8xf32> to vector<8xf32>
    %94 = vector.shape_cast %93 : vector<8xf32> to vector<8x1xf32>
    %95 = vector.broadcast %94 : vector<8x1xf32> to vector<8x8xf32>
    %96 = arith.divf %92, %95 : vector<8x8xf32>
    %cst_47 = arith.constant dense<0.000000e+00> : vector<8x32xf32>
    %97 = tpu.matmul %96, %75, %cst_47 {dimension_numbers = #tpu.dot_dimension_numbers<[1], [0], [0], [1], [0, 0, 1, 1], [], []>} : vector<8x8xf32>, vector<8x32xf32>, vector<8x32xf32> -> vector<8x32xf32>
    %98 = vector.extract_strided_slice %43 {offsets = [32, 0], sizes = [32, 128], strides = [1, 1]} : vector<128x128xf32> to vector<32x128xf32>
    %cst_48 = arith.constant dense<0.000000e+00> : vector<8x128xf32>
    %99 = tpu.matmul %97, %98, %cst_48 {dimension_numbers = #tpu.dot_dimension_numbers<[1], [0], [0], [1], [0, 0, 1, 1], [], []>} : vector<8x32xf32>, vector<32x128xf32>, vector<8x128xf32> -> vector<8x128xf32>
    %100 = arith.addf %72, %99 : vector<8x128xf32>
    %101 = vector.extract_strided_slice %28 {offsets = [0, 64], sizes = [8, 32], strides = [1, 1]} : vector<8x128xf32> to vector<8x32xf32>
    %102 = vector.extract_strided_slice %33 {offsets = [0, 64], sizes = [8, 32], strides = [1, 1]} : vector<8x128xf32> to vector<8x32xf32>
    %103 = vector.extract_strided_slice %38 {offsets = [0, 64], sizes = [8, 32], strides = [1, 1]} : vector<8x128xf32> to vector<8x32xf32>
    %cst_49 = arith.constant dense<0.000000e+00> : vector<8x8xf32>
    %104 = tpu.matmul %101, %102, %cst_49 {dimension_numbers = #tpu.dot_dimension_numbers<[1], [1], [0], [0], [0, 0, 1, 0], [], []>} : vector<8x32xf32>, vector<8x32xf32>, vector<8x8xf32> -> vector<8x8xf32>
    %cst_50 = arith.constant 0.176776692 : f32
    %105 = vector.broadcast %cst_50 : f32 to vector<8x8xf32>
    %106 = arith.mulf %104, %105 : vector<8x8xf32>
    %cst_51 = arith.constant 0.0333333351 : f32
    %107 = vector.broadcast %cst_51 : f32 to vector<8x8xf32>
    %108 = arith.mulf %106, %107 : vector<8x8xf32>
    %109 = math.tanh %108 : vector<8x8xf32>
    %cst_52 = arith.constant 3.000000e+01 : f32
    %110 = vector.broadcast %cst_52 : f32 to vector<8x8xf32>
    %111 = arith.mulf %110, %109 : vector<8x8xf32>
    %cst_53 = arith.constant 0xFF800000 : f32
    %112 = vector.shape_cast %42 : vector<1x8xi1> to vector<1x8xi1>
    %113 = vector.broadcast %112 : vector<1x8xi1> to vector<8x8xi1>
    %114 = vector.broadcast %cst_53 : f32 to vector<8x8xf32>
    %115 = arith.select %113, %114, %111 : vector<8x8xi1>, vector<8x8xf32>
    %cst_54 = arith.constant dense<0xFF800000> : vector<8xf32>
    %116 = vector.multi_reduction <maximumf>, %115, %cst_54 [1] : vector<8x8xf32> to vector<8xf32>
    %117 = vector.shape_cast %116 : vector<8xf32> to vector<8x1xf32>
    %118 = vector.broadcast %117 : vector<8x1xf32> to vector<8x8xf32>
    %119 = arith.subf %115, %118 : vector<8x8xf32>
    %120 = math.exp %119 : vector<8x8xf32>
    %cst_55 = arith.constant dense<0.000000e+00> : vector<8xf32>
    %121 = vector.multi_reduction <add>, %120, %cst_55 [1] : vector<8x8xf32> to vector<8xf32>
    %122 = vector.shape_cast %121 : vector<8xf32> to vector<8x1xf32>
    %123 = vector.broadcast %122 : vector<8x1xf32> to vector<8x8xf32>
    %124 = arith.divf %120, %123 : vector<8x8xf32>
    %cst_56 = arith.constant dense<0.000000e+00> : vector<8x32xf32>
    %125 = tpu.matmul %124, %103, %cst_56 {dimension_numbers = #tpu.dot_dimension_numbers<[1], [0], [0], [1], [0, 0, 1, 1], [], []>} : vector<8x8xf32>, vector<8x32xf32>, vector<8x32xf32> -> vector<8x32xf32>
    %126 = vector.extract_strided_slice %43 {offsets = [64, 0], sizes = [32, 128], strides = [1, 1]} : vector<128x128xf32> to vector<32x128xf32>
    %cst_57 = arith.constant dense<0.000000e+00> : vector<8x128xf32>
    %127 = tpu.matmul %125, %126, %cst_57 {dimension_numbers = #tpu.dot_dimension_numbers<[1], [0], [0], [1], [0, 0, 1, 1], [], []>} : vector<8x32xf32>, vector<32x128xf32>, vector<8x128xf32> -> vector<8x128xf32>
    %128 = arith.addf %100, %127 : vector<8x128xf32>
    %129 = vector.extract_strided_slice %28 {offsets = [0, 96], sizes = [8, 32], strides = [1, 1]} : vector<8x128xf32> to vector<8x32xf32>
    %130 = vector.extract_strided_slice %33 {offsets = [0, 96], sizes = [8, 32], strides = [1, 1]} : vector<8x128xf32> to vector<8x32xf32>
    %131 = vector.extract_strided_slice %38 {offsets = [0, 96], sizes = [8, 32], strides = [1, 1]} : vector<8x128xf32> to vector<8x32xf32>
    %cst_58 = arith.constant dense<0.000000e+00> : vector<8x8xf32>
    %132 = tpu.matmul %129, %130, %cst_58 {dimension_numbers = #tpu.dot_dimension_numbers<[1], [1], [0], [0], [0, 0, 1, 0], [], []>} : vector<8x32xf32>, vector<8x32xf32>, vector<8x8xf32> -> vector<8x8xf32>
    %cst_59 = arith.constant 0.176776692 : f32
    %133 = vector.broadcast %cst_59 : f32 to vector<8x8xf32>
    %134 = arith.mulf %132, %133 : vector<8x8xf32>
    %cst_60 = arith.constant 0.0333333351 : f32
    %135 = vector.broadcast %cst_60 : f32 to vector<8x8xf32>
    %136 = arith.mulf %134, %135 : vector<8x8xf32>
    %137 = math.tanh %136 : vector<8x8xf32>
    %cst_61 = arith.constant 3.000000e+01 : f32
    %138 = vector.broadcast %cst_61 : f32 to vector<8x8xf32>
    %139 = arith.mulf %138, %137 : vector<8x8xf32>
    %cst_62 = arith.constant 0xFF800000 : f32
    %140 = vector.shape_cast %42 : vector<1x8xi1> to vector<1x8xi1>
    %141 = vector.broadcast %140 : vector<1x8xi1> to vector<8x8xi1>
    %142 = vector.broadcast %cst_62 : f32 to vector<8x8xf32>
    %143 = arith.select %141, %142, %139 : vector<8x8xi1>, vector<8x8xf32>
    %cst_63 = arith.constant dense<0xFF800000> : vector<8xf32>
    %144 = vector.multi_reduction <maximumf>, %143, %cst_63 [1] : vector<8x8xf32> to vector<8xf32>
    %145 = vector.shape_cast %144 : vector<8xf32> to vector<8x1xf32>
    %146 = vector.broadcast %145 : vector<8x1xf32> to vector<8x8xf32>
    %147 = arith.subf %143, %146 : vector<8x8xf32>
    %148 = math.exp %147 : vector<8x8xf32>
    %cst_64 = arith.constant dense<0.000000e+00> : vector<8xf32>
    %149 = vector.multi_reduction <add>, %148, %cst_64 [1] : vector<8x8xf32> to vector<8xf32>
    %150 = vector.shape_cast %149 : vector<8xf32> to vector<8x1xf32>
    %151 = vector.broadcast %150 : vector<8x1xf32> to vector<8x8xf32>
    %152 = arith.divf %148, %151 : vector<8x8xf32>
    %cst_65 = arith.constant dense<0.000000e+00> : vector<8x32xf32>
    %153 = tpu.matmul %152, %131, %cst_65 {dimension_numbers = #tpu.dot_dimension_numbers<[1], [0], [0], [1], [0, 0, 1, 1], [], []>} : vector<8x8xf32>, vector<8x32xf32>, vector<8x32xf32> -> vector<8x32xf32>
    %154 = vector.extract_strided_slice %43 {offsets = [96, 0], sizes = [32, 128], strides = [1, 1]} : vector<128x128xf32> to vector<32x128xf32>
    %cst_66 = arith.constant dense<0.000000e+00> : vector<8x128xf32>
    %155 = tpu.matmul %153, %154, %cst_66 {dimension_numbers = #tpu.dot_dimension_numbers<[1], [0], [0], [1], [0, 0, 1, 1], [], []>} : vector<8x32xf32>, vector<32x128xf32>, vector<8x128xf32> -> vector<8x128xf32>
    %156 = arith.addf %128, %155 : vector<8x128xf32>
    %c0_67 = arith.constant 0 : index
    %c0_68 = arith.constant 0 : index
    %157 = vector.load %arg12[%c0_67, %c0_68] : memref<1x128xf32, #tpu.memory_space<vmem>>, vector<1x128xf32>
    %158 = vector.broadcast %157 : vector<1x128xf32> to vector<8x128xf32>
    %159 = arith.addf %156, %158 : vector<8x128xf32>
    %160 = arith.addf %1, %159 : vector<8x128xf32>
    %c0_69 = arith.constant 0 : index
    %c0_70 = arith.constant 0 : index
    %c0_71 = arith.constant 0 : index
    %161 = vector.load %arg13[%c0_69, %c0_70, %c0_71] : memref<1x8x128xf32, #tpu.memory_space<vmem>>, vector<1x8x128xf32>
    %162 = vector.shape_cast %161 : vector<1x8x128xf32> to vector<8x128xf32>
    %163 = vector.shape_cast %160 : vector<8x128xf32> to vector<1x8x128xf32>
    tpu.vector_store %arg13[%c0_69, %c0_70, %c0_71], %163 {strides = array<i32>} : memref<1x8x128xf32, #tpu.memory_space<vmem>>, vector<1x8x128xf32>,
    return
  }
  func.func @transform_0(%arg0: i32) -> (i32, i32, i32) {
    %c0_i32 = arith.constant 0 : i32
    %c0_i32_0 = arith.constant 0 : i32
    %c0_i32_1 = arith.constant 0 : i32
    return %arg0, %c0_i32, %c0_i32_0 : i32, i32, i32
  }
  func.func @transform_1(%arg0: i32) -> (i32, i32, i32) {
    %c0_i32 = arith.constant 0 : i32
    %c0_i32_0 = arith.constant 0 : i32
    %c0_i32_1 = arith.constant 0 : i32
    return %arg0, %c0_i32, %c0_i32_0 : i32, i32, i32
  }
  func.func @transform_2(%arg0: i32) -> (i32, i32) {
    %c0_i32 = arith.constant 0 : i32
    %c0_i32_0 = arith.constant 0 : i32
    %c0_i32_1 = arith.constant 0 : i32
    return %c0_i32, %c0_i32_0 : i32, i32
  }
  func.func @transform_3(%arg0: i32) -> (i32, i32) {
    %c0_i32 = arith.constant 0 : i32
    %c0_i32_0 = arith.constant 0 : i32
    %c0_i32_1 = arith.constant 0 : i32
    return %c0_i32, %c0_i32_0 : i32, i32
  }
  func.func @transform_4(%arg0: i32) -> (i32, i32) {
    %c0_i32 = arith.constant 0 : i32
    %c0_i32_0 = arith.constant 0 : i32
    %c0_i32_1 = arith.constant 0 : i32
    return %c0_i32, %c0_i32_0 : i32, i32
  }
  func.func @transform_5(%arg0: i32) -> (i32, i32) {
    %c0_i32 = arith.constant 0 : i32
    %c0_i32_0 = arith.constant 0 : i32
    %c0_i32_1 = arith.constant 0 : i32
    return %c0_i32, %c0_i32_0 : i32, i32
  }
  func.func @transform_6(%arg0: i32) -> (i32, i32) {
    %c0_i32 = arith.constant 0 : i32
    %c0_i32_0 = arith.constant 0 : i32
    %c0_i32_1 = arith.constant 0 : i32
    return %c0_i32, %c0_i32_0 : i32, i32
  }
  func.func @transform_7(%arg0: i32) -> (i32, i32) {
    %c0_i32 = arith.constant 0 : i32
    %c0_i32_0 = arith.constant 0 : i32
    %c0_i32_1 = arith.constant 0 : i32
    return %c0_i32, %c0_i32_0 : i32, i32
  }
  func.func @transform_8(%arg0: i32) -> (i32, i32) {
    %c0_i32 = arith.constant 0 : i32
    %c0_i32_0 = arith.constant 0 : i32
    %c0_i32_1 = arith.constant 0 : i32
    return %c0_i32, %c0_i32_0 : i32, i32
  }
  func.func @transform_9(%arg0: i32) -> (i32, i32) {
    %c0_i32 = arith.constant 0 : i32
    %c0_i32_0 = arith.constant 0 : i32
    %c0_i32_1 = arith.constant 0 : i32
    return %c0_i32, %c0_i32_0 : i32, i32
  }
  func.func @transform_10(%arg0: i32) -> (i32, i32) {
    %c0_i32 = arith.constant 0 : i32
    %c0_i32_0 = arith.constant 0 : i32
    %c0_i32_1 = arith.constant 0 : i32
    return %c0_i32, %c0_i32_0 : i32, i32
  }
  func.func @transform_11(%arg0: i32) -> (i32, i32) {
    %c0_i32 = arith.constant 0 : i32
    %c0_i32_0 = arith.constant 0 : i32
    %c0_i32_1 = arith.constant 0 : i32
    return %c0_i32, %c0_i32_0 : i32, i32
  }
  func.func @transform_12(%arg0: i32) -> (i32, i32, i32) {
    %c0_i32 = arith.constant 0 : i32
    %c0_i32_0 = arith.constant 0 : i32
    %c0_i32_1 = arith.constant 0 : i32
    return %arg0, %c0_i32, %c0_i32_0 : i32, i32, i32
  }
}

</mosaic_0001>

<bundles_post_ra>
// kernel: tpu_custom_call.1
= control target key start
LH: loop header
LB: loop body
LE: loop exit
PB: predicated region body
PF: predicated region fallthrough
CT: control target
= control target key end

     0   :  { %s3873_s0 = inlined_call_operand.hbm [shape: f32[2,8,128], index: 0, kind: input, shape index: {}]   ;;  %s3874_s1 = inlined_call_operand.hbm [shape: s32[2,1,8], index: 1, kind: input, shape index: {}]   ;;  %s3875_s2 = inlined_call_operand.hbm [shape: f32[1,128], index: 2, kind: input, shape index: {}]   ;;  %s3876_s3 = inlined_call_operand.hbm [shape: f32[1,128], index: 3, kind: input, shape index: {}]   ;;  %s3877_s4 = inlined_call_operand.hbm [shape: f32[128,128], index: 4, kind: input, shape index: {}]   ;;  %s3878_s5 = inlined_call_operand.hbm [shape: f32[1,128], index: 5, kind: input, shape index: {}]   ;;  %s3879_s6 = inlined_call_operand.hbm [shape: f32[128,128], index: 6, kind: input, shape index: {}]   ;;  %s3880_s7 = inlined_call_operand.hbm [shape: f32[1,128], index: 7, kind: input, shape index: {}]   ;;  %s3881_s8 = inlined_call_operand.hbm [shape: f32[128,128], index: 8, kind: input, shape index: {}]   ;;  %s3882_s9 = inlined_call_operand.hbm [shape: f32[1,128], index: 9, kind: input, shape index: {}]   ;;  %s3883_s10 = inlined_call_operand.hbm [shape: f32[128,128], index: 10, kind: input, shape index: {}]   ;;  %s3884_s11 = inlined_call_operand.hbm [shape: f32[1,128], index: 11, kind: input, shape index: {}]   ;;  %s3885_s12 = inlined_call_operand.hbm [shape: f32[2,8,128], index: 12, kind: output, shape index: {}]  }
   0x1   :  { %3893 = sst [smem:[#allocation33_spill]] %s3873_s0 }
   0x2   :  { %3894 = sst [smem:[#allocation34_spill]] %s3874_s1 }
   0x3   :  { %3895 = sst [smem:[#allocation35_spill]] %s3875_s2 }
   0x4   :  { %3896 = sst [smem:[#allocation36_spill]] %s3876_s3 }
   0x5   :  { %3897 = sst [smem:[#allocation37_spill]] %s3877_s4 }
   0x6   :  { %3898 = sst [smem:[#allocation38_spill]] %s3878_s5 }
   0x7   :  { %3899 = sst [smem:[#allocation39_spill]] %s3885_s12 }
   0x8   :  { %17 = vsyncpa [#allocation3], 0 }
   0x9   :  { %19 = vsyncpa [#allocation3 + $0x1], 0 }
   0xa   :  { %20 = vsyncpa [#allocation6], 0 }
   0xb   :  { %22 = vsyncpa [#allocation6 + $0x1], 0 }
   0xc   :  { %23 = vsyncpa [#allocation9], 0 }
   0xd   :  { %24 = vsyncpa [#allocation12], 0 }
   0xe   :  { %25 = vsyncpa [#allocation15], 0 }
   0xf   :  { %26 = vsyncpa [#allocation18], 0 }
  0x10   :  { %27 = vsyncpa [#allocation21], 0 }
  0x11   :  { %28 = vsyncpa [#allocation4], 0 }
  0x12   :  { %30 = vsyncpa [#allocation4 + $0x1], 0  ;;  %s3246_s21 = smov 0   ;;  %s3248_s22 = smov 0  }
  0x13   :  { %s3250_s23 = smov 0   ;;  %s3252_s24 = smov 0  }
  0x14 LB: > { %s3159_s25 = smov [#allocation7]   ;;  %s3267_s27 = sadd.s32 4294967295, %s3157_s24   ;;  %s3157_s24 = sphi %s3252_s24, %s3939_s24   ;;  %s3153_s23 = sphi %s3250_s23, %s3938_s23   ;;  %s3149_s22 = sphi %s3248_s22, %s3937_s22   ;;  %s3145_s21 = sphi %s3246_s21, %s3936_s21  }
  0x15   : > { %s342_s26 = sshll.u32 %s3159_s25, 4  ;;  %p2110_p0 = scmp.ge.s32.totalorder %s3157_s24, 1  ;;  %s3272_s26 = int_to_ptr.vmem [resolvable:$true] %s342_s26 }
  0x16   : > { %p3889_p1 = scmp.eq.s32.totalorder %s3267_s27, 0  ;;  %p329_p2 = scmp.lt.s32.totalorder %s3157_s24, 3 }
  0x17   : > { %s3160_s29 = smov [#allocation8]   ;;  %s3161_s13 = smov [#allocation11]  }
  0x18   : > { %p3274_p3 = pnand %p2110_p0, %p329_p2  ;;  %s353_s30 = sshll.u32 %s3160_s29, 4  ;;  %s3281_s30 = int_to_ptr.vmem [resolvable:$true] %s353_s30 }
  0x19   : > { %s377_s14 = sshll.u32 %s3161_s13, 4  ;;  %s3162_s16 = smov [#allocation14]   ;;  %s3289_s14 = int_to_ptr.vmem [resolvable:$true] %s377_s14 }
  0x1a   : > { %s3900_s28 = scalar_select %p3274_p3, 1, 0 }
  0x1b   : > { %p2582_p5 = pneg %p3274_p3  ;;  %s3291_s17 = sshll.u32 %s3162_s16, 4  ;;  %s402_s17 = int_to_ptr.vmem [resolvable:$true] %s3291_s17 }
  0x1c   : > { %3901 = sst [smem:[#allocation32_spill]] %s3900_s28  ;;  %s3903_s2 = sld [smem:[#allocation35_spill]] }
  0x1d   : > { %p3285_p6 = pnand %p2582_p5, %p3889_p1 }
  0x1f   : > { %p3301_p8 = pneg %p3285_p6 }
  0x22   : > { %s2723_s20 = scalar_lea.hbm %s3903_s2, 16 }
  0x23   : > { %p2724_p7 = scmp.ne.s32.totalorder %s3903_s2, %s2723_s20  ;;  %p2730_p11 = scmp.lt.u32.totalorder %s2723_s20, %s3903_s2 }
  0x25   : > { %p2726_p9 = pnand %p3301_p8, %p2724_p7 }
  0x27   : > { %p2727_p10 = pneg %p2726_p9 }
  0x29   : > { %p2732_p12 = pnand %p2730_p11, %p2727_p10 }
  0x2b   : > { %2735 = shalt.err (!%p2732_p12)
}
  0x2c   : > { %s2736_s18 = scalar_lea.vmem %s3272_s26, 16  ;;  %s2743_s19 = scalar_lea.vmem %s3272_s26, 32 }
  0x2d   : > { %p2737_p13 = scmp.ne.s32.totalorder %s3272_s26, %s2736_s18  ;;  %p2744_p5 = scmp.lt.s32.totalorder %s3272_s26, %s3272_s26 }
  0x2e   : > { %p2745_p7 = scmp.lt.s32.totalorder %s2743_s19, %s2736_s18 }
  0x2f   : > { %p2739_p0 = pnand %p2737_p13, %p3301_p8 }
  0x30   : > { %p2746_p9 = por %p2745_p7, %p2744_p5 }
  0x31   : > { %p2740_p2 = pneg %p2739_p0 }
  0x33   : > { %p2747_p4 = pnand %p2746_p9, %p2740_p2 }
  0x35   : > { %2750 = shalt.err (!%p2747_p4)
}
  0x36   : > { %2585 = dma.hbm_to_vmem [thread:$0]  (!%p3285_p6), %s3903_s2, 16, %s3272_s26, [#allocation6]  }
  0x37   : > { %s3905_s3 = sld [smem:[#allocation36_spill]] }
  0x3d   : > { %s2751_s16 = scalar_lea.hbm %s3905_s3, 16 }
  0x3e   : > { %p2752_p10 = scmp.ne.s32.totalorder %s3905_s3, %s2751_s16  ;;  %p2758_p4 = scmp.lt.u32.totalorder %s2751_s16, %s3905_s3 }
  0x40   : > { %p2754_p11 = pnand %p2752_p10, %p3301_p8 }
  0x42   : > { %p2755_p12 = pneg %p2754_p11 }
  0x44   : > { %p2760_p13 = pnand %p2758_p4, %p2755_p12 }
  0x46   : > { %2763 = shalt.err (!%p2760_p13)
}
  0x47   : > { %s2764_s26 = scalar_lea.vmem %s3281_s30, 16  ;;  %s2771_s1 = scalar_lea.vmem %s3281_s30, 32 }
  0x48   : > { %p2765_p0 = scmp.ne.s32.totalorder %s3281_s30, %s2764_s26  ;;  %p2772_p7 = scmp.lt.s32.totalorder %s3281_s30, %s3281_s30 }
  0x49   : > { %p2773_p9 = scmp.lt.s32.totalorder %s2771_s1, %s2764_s26 }
  0x4a   : > { %p2767_p2 = pnand %p2765_p0, %p3301_p8 }
  0x4b   : > { %p2774_p10 = por %p2773_p9, %p2772_p7 }
  0x4c   : > { %p2768_p5 = pneg %p2767_p2 }
  0x4e   : > { %p2775_p11 = pnand %p2774_p10, %p2768_p5 }
  0x50   : > { %2778 = shalt.err (!%p2775_p11)
}
  0x51   : > { %2588 = dma.hbm_to_vmem [thread:$0]  (!%p3285_p6), %s3905_s3, 16, %s3281_s30, [#allocation9]  }
  0x52   : > { %s3906_s5 = sld [smem:[#allocation38_spill]] }
  0x58   : > { %s2779_s29 = scalar_lea.hbm %s3906_s5, 16 }
  0x59   : > { %p2780_p12 = scmp.ne.s32.totalorder %s3906_s5, %s2779_s29  ;;  %p2786_p0 = scmp.lt.u32.totalorder %s2779_s29, %s3906_s5 }
  0x5b   : > { %p2782_p4 = pnand %p2780_p12, %p3301_p8 }
  0x5d   : > { %p2783_p13 = pneg %p2782_p4 }
  0x5f   : > { %p2788_p2 = pnand %p2786_p0, %p2783_p13 }
  0x61   : > { %2791 = shalt.err (!%p2788_p2)
}
  0x62   : > { %s2792_s30 = scalar_lea.vmem %s3289_s14, 16  ;;  %s2799_s1 = scalar_lea.vmem %s3289_s14, 32 }
  0x63   : > { %p2793_p5 = scmp.ne.s32.totalorder %s3289_s14, %s2792_s30  ;;  %p2800_p10 = scmp.lt.s32.totalorder %s3289_s14, %s3289_s14 }
  0x64   : > { %p2801_p11 = scmp.lt.s32.totalorder %s2799_s1, %s2792_s30 }
  0x65   : > { %p2795_p7 = pnand %p2793_p5, %p3301_p8 }
  0x66   : > { %p2802_p12 = por %p2801_p11, %p2800_p10 }
  0x67   : > { %p2796_p9 = pneg %p2795_p7 }
  0x69   : > { %p2803_p4 = pnand %p2802_p12, %p2796_p9 }
  0x6b   : > { %2806 = shalt.err (!%p2803_p4)
}
  0x6c   : > { %2594 = dma.hbm_to_vmem [thread:$0]  (!%p3285_p6), %s3906_s5, 16, %s3289_s14, [#allocation12]  }
  0x6d   : > { %s3163_s20 = smov [#allocation17]   ;;  %s2807_s18 = scalar_lea.hbm %s3880_s7, 16 }
  0x6e   : > { %s425_s25 = sshll.u32 %s3163_s20, 4  ;;  %p2808_p13 = scmp.ne.s32.totalorder %s3880_s7, %s2807_s18  ;;  %s426_s25 = int_to_ptr.vmem [resolvable:$true] %s425_s25 }
  0x6f   : > { %p2814_p5 = scmp.lt.u32.totalorder %s2807_s18, %s3880_s7 }
  0x70   : > { %p2810_p0 = pnand %p2808_p13, %p3301_p8 }
  0x72   : > { %p2811_p2 = pneg %p2810_p0 }
  0x74   : > { %p2816_p7 = pnand %p2814_p5, %p2811_p2 }
  0x76   : > { %2819 = shalt.err (!%p2816_p7)
}
  0x77   : > { %s2820_s14 = scalar_lea.vmem %s402_s17, 16  ;;  %s2827_s28 = scalar_lea.vmem %s402_s17, 32 }
  0x78   : > { %p2821_p9 = scmp.ne.s32.totalorder %s402_s17, %s2820_s14  ;;  %p2828_p12 = scmp.lt.s32.totalorder %s402_s17, %s402_s17 }
  0x79   : > { %p2829_p4 = scmp.lt.s32.totalorder %s2827_s28, %s2820_s14 }
  0x7a   : > { %p2823_p10 = pnand %p2821_p9, %p3301_p8 }
  0x7b   : > { %p2830_p1 = por %p2829_p4, %p2828_p12 }
  0x7c   : > { %p2824_p11 = pneg %p2823_p10 }
  0x7e   : > { %p2831_p3 = pnand %p2830_p1, %p2824_p11 }
  0x80   : > { %2834 = shalt.err (!%p2831_p3)
}
  0x81   : > { %2600 = dma.hbm_to_vmem [thread:$0]  (!%p3285_p6), %s3880_s7, 16, %s402_s17, [#allocation15]  }
  0x82   : > { %s2835_s18 = scalar_lea.hbm %s3882_s9, 16 }
  0x83   : > { %p2836_p13 = scmp.ne.s32.totalorder %s3882_s9, %s2835_s18  ;;  %p2842_p3 = scmp.lt.u32.totalorder %s2835_s18, %s3882_s9 }
  0x85   : > { %p2838_p0 = pnand %p2836_p13, %p3301_p8 }
  0x87   : > { %p2839_p1 = pneg %p2838_p0 }
  0x89   : > { %p2844_p2 = pnand %p2842_p3, %p2839_p1 }
  0x8b   : > { %2847 = shalt.err (!%p2844_p2)
}
  0x8c   : > { %s2848_s14 = scalar_lea.vmem %s426_s25, 16  ;;  %s2855_s17 = scalar_lea.vmem %s426_s25, 32 }
  0x8d   : > { %p2849_p5 = scmp.ne.s32.totalorder %s426_s25, %s2848_s14  ;;  %p2856_p10 = scmp.lt.s32.totalorder %s426_s25, %s426_s25 }
  0x8e   : > { %p2857_p11 = scmp.lt.s32.totalorder %s2855_s17, %s2848_s14 }
  0x8f   : > { %p2851_p7 = pnand %p2849_p5, %p3301_p8 }
  0x90   : > { %p2858_p12 = por %p2857_p11, %p2856_p10 }
  0x91   : > { %p2852_p9 = pneg %p2851_p7 }
  0x93   : > { %p2859_p4 = pnand %p2858_p12, %p2852_p9 }
  0x95   : > { %2862 = shalt.err (!%p2859_p4)
}
  0x96   : > { %2606 = dma.hbm_to_vmem [thread:$0]  (!%p3285_p6), %s3882_s9, 16, %s426_s25, [#allocation18]  }
  0x97   : > { %s3164_s20 = smov [#allocation10]   ;;  %s3907_s4 = sld [smem:[#allocation37_spill]] }
  0x98   : > { %s363_s29 = sshll.u32 %s3164_s20, 4  ;;  %s364_s29 = int_to_ptr.vmem [resolvable:$true] %s363_s29 }
  0x9d   : > { %s2863_s19 = scalar_lea.hbm %s3907_s4, 2048 }
  0x9e   : > { %p2864_p13 = scmp.ne.s32.totalorder %s3907_s4, %s2863_s19  ;;  %p2870_p3 = scmp.lt.u32.totalorder %s2863_s19, %s3907_s4 }
  0xa0   : > { %p2866_p0 = pnand %p2864_p13, %p3301_p8 }
  0xa2   : > { %p2867_p1 = pneg %p2866_p0 }
  0xa4   : > { %p2872_p2 = pnand %p2870_p3, %p2867_p1 }
  0xa6   : > { %2875 = shalt.err (!%p2872_p2)
}
  0xa7   : > { %s2876_s25 = scalar_lea.vmem %s364_s29, 2048  ;;  %p2884_p10 = scmp.lt.s32.totalorder %s364_s29, %s364_s29 }
  0xa8   : > { %p2877_p5 = scmp.ne.s32.totalorder %s364_s29, %s2876_s25  ;;  %p2885_p11 = scmp.lt.s32.totalorder %s2876_s25, %s2876_s25 }
  0xaa   : > { %p2879_p7 = pnand %p2877_p5, %p3301_p8  ;;  %p2886_p12 = por %p2885_p11, %p2884_p10 }
  0xac   : > { %p2880_p9 = pneg %p2879_p7 }
  0xae   : > { %p2887_p4 = pnand %p2886_p12, %p2880_p9 }
  0xb0   : > { %2890 = shalt.err (!%p2887_p4)
}
  0xb1   : > { %s3165_s17 = smov 128   ;;  %s3166_s28 = smov 8  }
  0xb2   : > { %2591 = dma.hbm_to_vmem [thread:$0]  (!%p3285_p6), %s3907_s4, 2048, %s364_s29, [#allocation9], %s3165_s17, %s3165_s17, %s3166_s28  }
  0xb3   : > { %s3167_s16 = smov [#allocation13]   ;;  %s3168_s19 = smov [#allocation16]  }
  0xb4   : > { %s387_s18 = sshll.u32 %s3167_s16, 4  ;;  %s411_s26 = sshll.u32 %s3168_s19, 4  ;;  %s388_s18 = int_to_ptr.vmem [resolvable:$true] %s387_s18  ;;  %s3429_s26 = int_to_ptr.vmem [resolvable:$true] %s411_s26 }
  0xb5   : > { %s2891_s14 = scalar_lea.hbm %s3879_s6, 2048 }
  0xb6   : > { %p2892_p13 = scmp.ne.s32.totalorder %s3879_s6, %s2891_s14  ;;  %p2898_p3 = scmp.lt.u32.totalorder %s2891_s14, %s3879_s6 }
  0xb8   : > { %p2894_p0 = pnand %p2892_p13, %p3301_p8 }
  0xba   : > { %p2895_p1 = pneg %p2894_p0 }
  0xbc   : > { %p2900_p2 = pnand %p2898_p3, %p2895_p1 }
  0xbe   : > { %2903 = shalt.err (!%p2900_p2)
}
  0xbf   : > { %s2904_s20 = scalar_lea.vmem %s388_s18, 2048  ;;  %p2912_p10 = scmp.lt.s32.totalorder %s388_s18, %s388_s18 }
  0xc0   : > { %p2905_p5 = scmp.ne.s32.totalorder %s388_s18, %s2904_s20  ;;  %p2913_p11 = scmp.lt.s32.totalorder %s2904_s20, %s2904_s20 }
  0xc2   : > { %p2907_p7 = pnand %p2905_p5, %p3301_p8  ;;  %p2914_p12 = por %p2913_p11, %p2912_p10 }
  0xc4   : > { %p2908_p9 = pneg %p2907_p7 }
  0xc6   : > { %p2915_p4 = pnand %p2914_p12, %p2908_p9 }
  0xc8   : > { %2918 = shalt.err (!%p2915_p4)
}
  0xc9   : > { %2597 = dma.hbm_to_vmem [thread:$0]  (!%p3285_p6), %s3879_s6, 2048, %s388_s18, [#allocation12], %s3165_s17, %s3165_s17, %s3166_s28  }
  0xca   : > { %s2919_s1 = scalar_lea.hbm %s3881_s8, 2048 }
  0xcb   : > { %p2920_p13 = scmp.ne.s32.totalorder %s3881_s8, %s2919_s1  ;;  %p2926_p3 = scmp.lt.u32.totalorder %s2919_s1, %s3881_s8 }
  0xcd   : > { %p2922_p0 = pnand %p2920_p13, %p3301_p8 }
  0xcf   : > { %p2923_p1 = pneg %p2922_p0 }
  0xd1   : > { %p2928_p2 = pnand %p2926_p3, %p2923_p1 }
  0xd3   : > { %2931 = shalt.err (!%p2928_p2)
}
  0xd4   : > { %s2932_s18 = scalar_lea.vmem %s3429_s26, 2048  ;;  %p2940_p10 = scmp.lt.s32.totalorder %s3429_s26, %s3429_s26 }
  0xd5   : > { %p2933_p5 = scmp.ne.s32.totalorder %s3429_s26, %s2932_s18  ;;  %p2941_p11 = scmp.lt.s32.totalorder %s2932_s18, %s2932_s18 }
  0xd7   : > { %p2935_p7 = pnand %p2933_p5, %p3301_p8  ;;  %p2942_p12 = por %p2941_p11, %p2940_p10 }
  0xd9   : > { %p2936_p9 = pneg %p2935_p7 }
  0xdb   : > { %p2943_p4 = pnand %p2942_p12, %p2936_p9 }
  0xdd   : > { %2946 = shalt.err (!%p2943_p4)
}
  0xde   : > { %2603 = dma.hbm_to_vmem [thread:$0]  (!%p3285_p6), %s3881_s8, 2048, %s3429_s26, [#allocation15], %s3165_s17, %s3165_s17, %s3166_s28  }
  0xdf   : > { %s3169_s16 = smov [#allocation19]   ;;  %s3170_s30 = smov [#allocation20]  }
  0xe0   : > { %s435_s19 = sshll.u32 %s3169_s16, 4  ;;  %s449_s1 = sshll.u32 %s3170_s30, 4  ;;  %s436_s19 = int_to_ptr.vmem [resolvable:$true] %s435_s19  ;;  %s3478_s1 = int_to_ptr.vmem [resolvable:$true] %s449_s1 }
  0xe1   : > { %s2947_s12 = scalar_lea.hbm %s3883_s10, 2048 }
  0xe2   : > { %p2948_p13 = scmp.ne.s32.totalorder %s3883_s10, %s2947_s12  ;;  %p2954_p3 = scmp.lt.u32.totalorder %s2947_s12, %s3883_s10 }
  0xe4   : > { %p2950_p0 = pnand %p2948_p13, %p3301_p8 }
  0xe6   : > { %p2951_p1 = pneg %p2950_p0 }
  0xe8   : > { %p2956_p2 = pnand %p2954_p3, %p2951_p1 }
  0xea   : > { %2959 = shalt.err (!%p2956_p2)
}
  0xeb   : > { %s2960_s2 = scalar_lea.vmem %s436_s19, 2048  ;;  %p2968_p10 = scmp.lt.s32.totalorder %s436_s19, %s436_s19 }
  0xec   : > { %p2961_p5 = scmp.ne.s32.totalorder %s436_s19, %s2960_s2  ;;  %p2969_p11 = scmp.lt.s32.totalorder %s2960_s2, %s2960_s2 }
  0xee   : > { %p2963_p7 = pnand %p2961_p5, %p3301_p8  ;;  %p2970_p12 = por %p2969_p11, %p2968_p10 }
  0xf0   : > { %p2964_p9 = pneg %p2963_p7 }
  0xf2   : > { %p2971_p4 = pnand %p2970_p12, %p2964_p9 }
  0xf4   : > { %2974 = shalt.err (!%p2971_p4)
}
  0xf5   : > { %2609 = dma.hbm_to_vmem [thread:$0]  (!%p3285_p6), %s3883_s10, 2048, %s436_s19, [#allocation18], %s3165_s17, %s3165_s17, %s3166_s28  }
  0xf6   : > { %s2975_s12 = scalar_lea.hbm %s3884_s11, 16 }
  0xf7   : > { %p2976_p13 = scmp.ne.s32.totalorder %s3884_s11, %s2975_s12  ;;  %p2982_p3 = scmp.lt.u32.totalorder %s2975_s12, %s3884_s11 }
  0xf9   : > { %p2978_p0 = pnand %p2976_p13, %p3301_p8 }
  0xfb   : > { %p2979_p1 = pneg %p2978_p0 }
  0xfd   : > { %p2984_p2 = pnand %p2982_p3, %p2979_p1 }
  0xff   : > { %2987 = shalt.err (!%p2984_p2)
}
 0x100   : > { %s2988_s17 = scalar_lea.vmem %s3478_s1, 16  ;;  %s2995_s28 = scalar_lea.vmem %s3478_s1, 32 }
 0x101   : > { %p2989_p5 = scmp.ne.s32.totalorder %s3478_s1, %s2988_s17  ;;  %p2996_p10 = scmp.lt.s32.totalorder %s3478_s1, %s3478_s1 }
 0x102   : > { %p2997_p11 = scmp.lt.s32.totalorder %s2995_s28, %s2988_s17 }
 0x103   : > { %p2991_p7 = pnand %p2989_p5, %p3301_p8 }
 0x104   : > { %p2998_p12 = por %p2997_p11, %p2996_p10 }
 0x105   : > { %p2992_p9 = pneg %p2991_p7 }
 0x107   : > { %p2999_p4 = pnand %p2998_p12, %p2992_p9 }
 0x109   : > { %3002 = shalt.err (!%p2999_p4)
}
 0x10a   : > { %2612 = dma.hbm_to_vmem [thread:$0]  (!%p3285_p6), %s3884_s11, 16, %s3478_s1, [#allocation21]  }
 0x10b   : > { %s2109_s15 = sadd.s32 4294967294, %s3157_s24   ;;  %s3527_s13 = sadd.s32 1, %s3157_s24  }
 0x10c   : > { %s40_s16 = ssub.s32 %s3157_s24, %s3527_s13  ;;  %s43_s30 = sadd.s32 1, %s3153_s23 }
 0x10d   : > { %p41_p8 = scmp.eq.s32.totalorder %s40_s16, 0  ;;  %p50_p13 = scmp.ne.s32.totalorder %s3153_s23, %s3149_s22 }
 0x10e   : > { %p51_p0 = scmp.eq.s32.totalorder %s3157_s24, 0  ;;  %p56_p1 = scmp.ne.s32.totalorder %s3149_s22, %s3145_s21 }
 0x10f   : > { %s3538_s14 = scalar_select %p41_p8, %s3153_s23, %s43_s30  }
 0x110   : > { %p3540_p3 = por %p51_p0, %p50_p13  ;;  %p3909_p2 = scmp.eq.s32.totalorder %s3267_s27, 0 }
 0x111   : > { %p316_p5 = scmp.eq.s32.totalorder %s3267_s27, 1  ;;  %p322_p7 = scmp.eq.s32.totalorder %s2109_s15, 1 }
 0x112   : > { %p3546_p6 = por %p3909_p2, %p56_p1  ;;  %p2634_p9 = scmp.lt.s32.totalorder %s3157_s24, 2 }
 0x113   : > { %s3553_s12 = sand.u32 1, %s3153_s23   ;;  %p3555_p10 = por %p316_p5, %p50_p13 }
 0x114   : > { %s3910_s1 = scalar_select %p3546_p6, 1, 0 }
 0x115   : > { %s3911_s29 = scalar_select %p3555_p10, 1, 0 }
 0x116   : > { %p3559_p11 = por %p322_p7, %p56_p1  ;;  %s2122_s20 = sshll.u32 %s3553_s12, 3 }
 0x117   : > { %s2123_s26 = sshll.u32 %s3157_s24, 7  ;;  %s3913_s0 = sld [smem:[#allocation33_spill]] }
 0x118   : > { %s3912_s18 = scalar_select %p3559_p11, 1, 0 }
 0x119   : > { %s464_s2 = scalar_lea.vmem [#allocation2], %s2122_s20  ;;  %p3574_p12 = pnand %p2634_p9, %p3540_p3 }
 0x11a   : > { %s471_s15 = sshll.u32 %s464_s2, 4  ;;  %s461_s3 = scalar_lea.sflag [#allocation3], %s3553_s12  ;;  %s3570_s15 = int_to_ptr.vmem [resolvable:$true] %s471_s15 }
 0x11b   : > { %p3005_p8 = pneg %p3574_p12 }
 0x11d   : > { %s3568_s19 = scalar_lea.hbm %s3913_s0, %s2123_s26  ;;  %s3008_s25 = scalar_lea.hbm %s3913_s0, 256 }
 0x11e   : > { %s3003_s17 = scalar_lea.hbm %s3568_s19, 128  ;;  %p3009_p1 = scmp.lt.u32.totalorder %s3568_s19, %s3913_s0 }
 0x11f   : > { %p3004_p4 = scmp.ne.s32.totalorder %s3568_s19, %s3003_s17  ;;  %p3010_p3 = scmp.lt.u32.totalorder %s3008_s25, %s3003_s17 }
 0x120   : > { %p3012_p5 = scmp.lt.u32.totalorder %s3003_s17, %s3568_s19 }
 0x121   : > { %p3006_p13 = pnand %p3005_p8, %p3004_p4  ;;  %p3011_p2 = por %p3010_p3, %p3009_p1 }
 0x123   : > { %p3007_p0 = pneg %p3006_p13  ;;  %p3013_p7 = por %p3012_p5, %p3011_p2 }
 0x125   : > { %p3014_p9 = pnand %p3013_p7, %p3007_p0 }
 0x127   : > { %3017 = shalt.err (!%p3014_p9)
}
 0x128   : > { %s3018_s30 = scalar_lea.vmem %s3570_s15, 128  ;;  %s3171_s20 = smov [#allocation2]  }
 0x129   : > { %p3019_p4 = scmp.ne.s32.totalorder %s3570_s15, %s3018_s30  ;;  %s3023_s26 = sshll.u32 %s3171_s20, 4  ;;  %s3024_s26 = int_to_ptr.vmem [resolvable:$false] %s3023_s26 }
 0x12a   : > { %s3025_s28 = scalar_lea.vmem %s3024_s26, 256  ;;  %p3026_p10 = scmp.lt.s32.totalorder %s3570_s15, %s3024_s26 }
 0x12b   : > { %p3021_p13 = pnand %p3019_p4, %p3005_p8  ;;  %p3027_p1 = scmp.lt.s32.totalorder %s3025_s28, %s3018_s30 }
 0x12d   : > { %p3022_p11 = pneg %p3021_p13  ;;  %p3028_p3 = por %p3027_p1, %p3026_p10 }
 0x12f   : > { %p3029_p2 = pnand %p3028_p3, %p3022_p11 }
 0x131   : > { %3032 = shalt.err (!%p3029_p2)
}
 0x132   : > { %2616 = dma.hbm_to_vmem [thread:$0]  (!%p3574_p12), %s3568_s19, 128, %s3570_s15, %s461_s3  }
 0x133   : > { %s2124_s17 = sshll.u32 %s3157_s24, 4  ;;  %s481_s25 = scalar_lea.vmem [#allocation5], %s3553_s12 }
 0x134   : > { %s488_s2 = sshll.u32 %s481_s25, 4  ;;  %s3915_s4 = sld [smem:[#allocation34_spill]]  ;;  %s489_s2 = int_to_ptr.vmem [resolvable:$true] %s488_s2 }
 0x135   : > { %s3916_s30 = sand.u32 1, %s3157_s24  }
 0x136   : > { %s479_s28 = scalar_lea.sflag [#allocation6], %s3916_s30 }
 0x13a   : > { %s3610_s26 = scalar_lea.hbm %s3915_s4, %s2124_s17  ;;  %s3038_s19 = scalar_lea.hbm %s3915_s4, 32 }
 0x13b   : > { %s3033_s5 = scalar_lea.hbm %s3610_s26, 16  ;;  %p3039_p5 = scmp.lt.u32.totalorder %s3610_s26, %s3915_s4 }
 0x13c   : > { %p3034_p10 = scmp.ne.s32.totalorder %s3610_s26, %s3033_s5  ;;  %p3040_p7 = scmp.lt.u32.totalorder %s3038_s19, %s3033_s5 }
 0x13d   : > { %p3042_p4 = scmp.lt.u32.totalorder %s3033_s5, %s3610_s26 }
 0x13e   : > { %p3036_p11 = pnand %p3034_p10, %p3005_p8  ;;  %p3041_p9 = por %p3040_p7, %p3039_p5 }
 0x140   : > { %p3037_p0 = pneg %p3036_p11  ;;  %p3043_p13 = por %p3042_p4, %p3041_p9 }
 0x142   : > { %p3044_p1 = pnand %p3043_p13, %p3037_p0 }
 0x144   : > { %3047 = shalt.err (!%p3044_p1)
}
 0x145   : > { %s3048_s17 = scalar_lea.vmem %s489_s2, 16  ;;  %s3172_s25 = smov [#allocation5]  }
 0x146   : > { %p3049_p3 = scmp.ne.s32.totalorder %s489_s2, %s3048_s17  ;;  %s3053_s20 = sshll.u32 %s3172_s25, 4  ;;  %s3054_s20 = int_to_ptr.vmem [resolvable:$false] %s3053_s20 }
 0x147   : > { %s3055_s30 = scalar_lea.vmem %s3054_s20, 32  ;;  %p3056_p11 = scmp.lt.s32.totalorder %s489_s2, %s3054_s20 }
 0x148   : > { %p3051_p2 = pnand %p3049_p3, %p3005_p8  ;;  %p3057_p6 = scmp.lt.s32.totalorder %s3055_s30, %s3048_s17 }
 0x14a   : > { %p3052_p10 = pneg %p3051_p2  ;;  %p3058_p5 = por %p3057_p6, %p3056_p11 }
 0x14c   : > { %p3059_p7 = pnand %p3058_p5, %p3052_p10 }
 0x14e   : > { %3062 = shalt.err (!%p3059_p7)
}
 0x14f   : > { %2619 = dma.hbm_to_vmem [thread:$0]  (!%p3574_p12), %s3610_s26, 16, %s489_s2, %s479_s28  }
 0x150   : > { %s3917_s5 = sld [smem:[#allocation32_spill]] }
 0x156   : > { %p3918_p0 = scmp.ne.s32.totalorder %s3917_s5, 0 }
 0x157   : > { %s3636_s3 = sand.u32 (!%p3918_p0), 1, %s3149_s22   ;;  %p3919_p6 = scmp.ne.s32.totalorder (!%p3918_p0), %s3910_s1, 0 }
 0x158   : > { %497 = sbr.rel (%p3918_p0) target bundleno = 3760 (0xeb0), region = 68  ;;  %s2126_s12 = sshll.u32 (!%p3918_p0), %s3636_s3, 3 }
 0x159   : > { %s500_s19 = scalar_lea.sflag (!%p3918_p0), [#allocation3], %s3636_s3  ;;  %s503_s0 = scalar_lea.vmem (!%p3918_p0), [#allocation2], %s2126_s12 }
 0x15f   : > { %3108 = dma.done.wait (%p3919_p6), %s500_s19, 128  }
 0x160   : > { %3110 = vsyncadd (%p3919_p6), %s500_s19, 4294967168  ;;  %s508_s16 = sand.u32 1, %s3267_s27   ;;  %s511_s26 = scalar_lea.vmem [#allocation5], %s3636_s3 }
 0x161   : > { %s509_s2 = scalar_lea.sflag [#allocation6], %s508_s16 }
 0x162   : > { %3112 = dma.done.wait (%p3919_p6), %s509_s2, 16  }
 0x163   : > { %3114 = vsyncadd (%p3919_p6), %s509_s2, 4294967280  ;;  %p3920_p12 = scmp.eq.s32.totalorder %s3267_s27, 0 }
 0x165   : > { %3116 = dma.done.wait (%p3920_p12), [#allocation6], 16   ;;  %p3921_p8 = pmov %p3920_p12 }
 0x167   : > { %3118 = vsyncadd (%p3921_p8), [#allocation6], 4294967280  ;;  %p3922_p9 = pmov %p3921_p8 }
 0x168   : > { %p3923_p4 = pmov %p3921_p8 }
 0x169   : > { %3120 = dma.done.wait (%p3922_p9), [#allocation9], 2064  }
 0x16a   : > { %3122 = vsyncadd (%p3923_p4), [#allocation9], 4294965232  ;;  %p3924_p13 = pmov %p3923_p4 }
 0x16b   : > { %p3925_p1 = pmov %p3923_p4 }
 0x16c   : > { %3124 = dma.done.wait (%p3924_p13), [#allocation12], 2064  }
 0x16d   : > { %3126 = vsyncadd (%p3925_p1), [#allocation12], 4294965232  ;;  %p3926_p3 = pmov %p3925_p1 }
 0x16e   : > { %p3927_p2 = pmov %p3925_p1 }
 0x16f   : > { %3128 = dma.done.wait (%p3926_p3), [#allocation15], 2064  }
 0x170   : > { %3130 = vsyncadd (%p3927_p2), [#allocation15], 4294965232  ;;  %p3928_p10 = pmov %p3925_p1 }
 0x171   : > { %p3929_p11 = pmov %p3925_p1 }
 0x172   : > { %3132 = dma.done.wait (%p3928_p10), [#allocation18], 2064  }
 0x173   : > { %3134 = vsyncadd (%p3929_p11), [#allocation18], 4294965232  ;;  %p3930_p5 = pmov %p3925_p1 }
 0x174   : > { %p3931_p7 = pmov %p3925_p1 }
 0x175   : > { %3136 = dma.done.wait (%p3930_p5), [#allocation21], 16  }
 0x176   : > { %3138 = vsyncadd (%p3931_p7), [#allocation21], 4294967280  ;;  %v3676_v0 = vld [vmem:[%s503_s0] sm:$0xff]  ;;  %v625_v1 = vld [vmem:[#allocation10] sm:$0xff]  ;;  %v3173_v4 = vmov 0.0|0.0   ;;  %vm3174_vm0 = vmmov 0  }
 0x177   : > { %597 = vadd.xlane.f32.xlu0 %v3676_v0  ;;  %v626_v2 = vld [vmem:[#allocation10 + $0x8] sm:$0xff]  ;;  %2440 = vmatprep.subr.bf16.mxu0 %v3173_v4  ;;  %v627_v7 = vld [vmem:[#allocation10 + $0x10] sm:$0xff]  ;;  %v628_v8 = vld [vmem:[#allocation10 + $0x18] sm:$0xff]  ;;  %v3175_v41 = vmov 0.0   ;;  %vm922_vm1 = vcmask 261120   ;;  %s3176_s1 = smov 96  }
 0x178   : > { %v718_v3 = vld [vmem:[#allocation13] sm:$0xff]  ;;  %v2441_v5 = vpack.c.bf16 %v626_v2, %v625_v1  ;;  %2464 = vmatprep.subr.bf16.mxu1 %v3173_v4  ;;  %v719_v6 = vld [vmem:[#allocation13 + $0x8] sm:$0xff]  ;;  %v720_v10 = vld [vmem:[#allocation13 + $0x10] sm:$0xff]  ;;  %v2444_v12 = vpack.c.bf16 %v628_v8, %v627_v7  ;;  %2283 = vmatprep.mubr.msk.f32.mxu0 %vm3174_vm0, %v3175_v41  ;;  %vm1010_vm4 = vcmask 64512   ;;  %s3178_s28 = smov 64   ;;  %s3179_s15 = smov 32  }
 0x179   : > { %v2465_v9 = vpack.c.bf16 %v719_v6, %v718_v3  ;;  %v721_v11 = vld [vmem:[#allocation13 + $0x18] sm:$0xff]  ;;  %v630_v15 = vld [vmem:[#allocation10 + $0x28] sm:$0xff]  ;;  %v631_v24 = vld [vmem:[#allocation10 + $0x30] sm:$0xff]  ;;  %2318 = vmatprep.mubr.msk.f32.mxu1 %vm3174_vm0, %v3175_v41  ;;  %s2161_s17 = sshll.u32 %s3267_s27, 7  ;;  %s595_s25 = scalar_lea.vmem [#allocation22], %s2126_s12 }
 0x17a   : > { %2442 = vmatpush3.bf16.msra.mxu0 %v2441_v5  ;;  %v2468_v13 = vpack.c.bf16 %v721_v11, %v720_v10  ;;  %v629_v14 = vld [vmem:[#allocation10 + $0x20] sm:$0xff]  ;;  %v723_v17 = vld [vmem:[#allocation13 + $0x28] sm:$0xff]  ;;  %v632_v25 = vld [vmem:[#allocation10 + $0x38] sm:$0xff]  ;;  %s1924_s20 = sshll.u32 %s595_s25, 4  ;;  %s3932_s19 = sld [smem:[#allocation39_spill]]  ;;  %s3831_s20 = int_to_ptr.vmem [resolvable:$true] %s1924_s20 }
 0x17b   : > { %2466 = vmatpush3.bf16.msra.mxu1 %v2465_v9  ;;  %2443 = vmatprep.subr.bf16.mxu0 %v3173_v4  ;;  %v722_v16 = vld [vmem:[#allocation13 + $0x20] sm:$0xff]  ;;  %v2447_v18 = vpack.c.bf16 %v630_v15, %v629_v14  ;;  %v2450_v26 = vpack.c.bf16 %v632_v25, %v631_v24  ;;  %v724_v27 = vld [vmem:[#allocation13 + $0x30] sm:$0xff]  ;;  %v725_v28 = vld [vmem:[#allocation13 + $0x38] sm:$0xff]  ;;  %s1911_s16 = scalar_lea.sflag [#allocation4], %s3636_s3  ;;  %s3063_s2 = scalar_lea.vmem %s3831_s20, 128 }
 0x17c   : > { %2467 = vmatprep.subr.bf16.mxu1 %v3173_v4  ;;  %v2471_v19 = vpack.c.bf16 %v723_v17, %v722_v16  ;;  %v2474_v29 = vpack.c.bf16 %v725_v28, %v724_v27  ;;  %v633_v30 = vld [vmem:[#allocation10 + $0x40] sm:$0xff]  ;;  %v634_v31 = vld [vmem:[#allocation10 + $0x48] sm:$0xff]  ;;  %v635_v36 = vld [vmem:[#allocation10 + $0x50] sm:$0xff]  ;;  %p3064_p0 = scmp.ne.s32.totalorder %s3831_s20, %s3063_s2  ;;  %p3933_p6 = scmp.ne.s32.totalorder %s3911_s29, 0 }
 0x17d   : > { %v2453_v32 = vpack.c.bf16 %v634_v31, %v633_v30  ;;  %v726_v33 = vld [vmem:[#allocation13 + $0x40] sm:$0xff]  ;;  %v727_v34 = vld [vmem:[#allocation13 + $0x48] sm:$0xff]  ;;  %v636_v37 = vld [vmem:[#allocation10 + $0x58] sm:$0xff]  ;;  %s3180_s27 = smov [#allocation22]  }
 0x17e   : > { %2445 = vmatpush3.bf16.msra.mxu0 %v2444_v12  ;;  %v2477_v35 = vpack.c.bf16 %v727_v34, %v726_v33  ;;  %v728_v38 = vld [vmem:[#allocation13 + $0x50] sm:$0xff]  ;;  %v2456_v39 = vpack.c.bf16 %v636_v37, %v635_v36  ;;  %v729_v40 = vld [vmem:[#allocation13 + $0x58] sm:$0xff]  ;;  %v638_v44 = vld [vmem:[#allocation10 + $0x68] sm:$0xff]  ;;  %p3065_p12 = pnand %p3064_p0, %p3933_p6  ;;  %s3067_s12 = sshll.u32 %s3180_s27, 4  ;;  %s3068_s12 = int_to_ptr.vmem [resolvable:$false] %s3067_s12 }
 0x17f   : > { %2469 = vmatpush3.bf16.msra.mxu1 %v2468_v13  ;;  %2446 = vmatprep.subr.bf16.mxu0 %v3173_v4  ;;  %v2480_v42 = vpack.c.bf16 %v729_v40, %v728_v38  ;;  %v637_v43 = vld [vmem:[#allocation10 + $0x60] sm:$0xff]  ;;  %v731_v46 = vld [vmem:[#allocation13 + $0x68] sm:$0xff]  ;;  %v640_v50 = vld [vmem:[#allocation10 + $0x78] sm:$0xff]  ;;  %v1004_v38 = vlaneseq  ;;  %p3070_p9 = scmp.lt.s32.totalorder %s3831_s20, %s3068_s12 }
 0x180   : > { %2470 = vmatprep.subr.bf16.mxu1 %v3173_v4  ;;  %v730_v45 = vld [vmem:[#allocation13 + $0x60] sm:$0xff]  ;;  %v2459_v47 = vpack.c.bf16 %v638_v44, %v637_v43  ;;  %v639_v49 = vld [vmem:[#allocation10 + $0x70] sm:$0xff]  ;;  %v733_v52 = vld [vmem:[#allocation13 + $0x78] sm:$0xff]  ;;  %s3829_s0 = scalar_lea.hbm %s3932_s19, %s2161_s17  ;;  %p3066_p8 = pneg %p3065_p12 }
 0x181   : > { %v2483_v48 = vpack.c.bf16 %v731_v46, %v730_v45  ;;  %v732_v51 = vld [vmem:[#allocation13 + $0x70] sm:$0xff]  ;;  %v2462_v53 = vpack.c.bf16 %v640_v50, %v639_v49  ;;  %v2138_v59 = vld [vmem:[#allocation7] ss:$0 sm:$0xff]  ;;  %v811_v61 = vld [vmem:[#allocation16] sm:$0xff]  ;;  %v1005_v45 = vshrl.u32 %v1004_v38, 7 }
 0x182   : > { %2448 = vmatpush3.bf16.msra.mxu0 %v2447_v18  ;;  %v2486_v54 = vpack.c.bf16 %v733_v52, %v732_v51  ;;  %v812_v62 = vld [vmem:[#allocation16 + $0x8] sm:$0xff]  ;;  %v2139_v63 = vld [vmem:[#allocation8] ss:$0 sm:$0xff]  ;;  %v813_v5 = vld [vmem:[#allocation16 + $0x10] sm:$0xff] }
 0x183   : > { %2472 = vmatpush3.bf16.msra.mxu1 %v2471_v19  ;;  %2449 = vmatprep.subr.bf16.mxu0 %v3173_v4  ;;  %v2489_v2 = vpack.c.bf16 %v812_v62, %v811_v61  ;;  %v814_v6 = vld [vmem:[#allocation16 + $0x18] sm:$0xff]  ;;  %v815_v8 = vld [vmem:[#allocation16 + $0x20] sm:$0xff]  ;;  %v816_v9 = vld [vmem:[#allocation16 + $0x28] sm:$0xff]  ;;  %v1006_v46 = vsub.s32 0, %v1005_v45 }
 0x184   : > { %2473 = vmatprep.subr.bf16.mxu1 %v3173_v4  ;;  %v2492_v7 = vpack.c.bf16 %v814_v6, %v813_v5  ;;  %v2495_v10 = vpack.c.bf16 %v816_v9, %v815_v8  ;;  %v817_v11 = vld [vmem:[#allocation16 + $0x30] sm:$0xff]  ;;  %v818_v12 = vld [vmem:[#allocation16 + $0x38] sm:$0xff]  ;;  %v819_v14 = vld [vmem:[#allocation16 + $0x40] sm:$0xff] }
 0x185   : > { %v2498_v13 = vpack.c.bf16 %v818_v12, %v817_v11  ;;  %v820_v15 = vld [vmem:[#allocation16 + $0x48] sm:$0xff]  ;;  %v821_v17 = vld [vmem:[#allocation16 + $0x50] sm:$0xff]  ;;  %v822_v18 = vld [vmem:[#allocation16 + $0x58] sm:$0xff] }
 0x186   : > { %2451 = vmatpush3.bf16.msra.mxu0 %v2450_v26  ;;  %v2501_v16 = vpack.c.bf16 %v820_v15, %v819_v14  ;;  %v2504_v19 = vpack.c.bf16 %v822_v18, %v821_v17  ;;  %v826_v24 = vld [vmem:[#allocation16 + $0x78] sm:$0xff]  ;;  %v2142_v34 = vld [vmem:[#allocation17] ss:$0 sm:$0xff]  ;;  %v904_v43 = vld [vmem:[%s511_s26] sm:$0x1]  ;;  %s3069_s26 = scalar_lea.vmem %s3068_s12, 256 }
 0x187   : > { %2475 = vmatpush3.bf16.msra.mxu1 %v2474_v29  ;;  %2452 = vmatprep.subr.bf16.mxu0 %v3173_v4  ;;  %v2141_v26 = vld [vmem:[#allocation14] ss:$0 sm:$0xff]  ;;  %v2140_v29 = vld [vmem:[#allocation11] ss:$0 sm:$0xff]  ;;  %vm905_vm2 = vcmp.ne.s32.totalorder %v904_v43, 0  ;;  %p3071_p4 = scmp.lt.s32.totalorder %s3069_s26, %s3063_s2 }
 0x188   : > { %2476 = vmatprep.subr.bf16.mxu1 %v3173_v4 }
 0x189   : > { %p3072_p13 = por %p3071_p4, %p3070_p9 }
 0x18a   : > { %2454 = vmatpush3.bf16.msra.mxu0 %v2453_v32 }
 0x18b   : > { %2478 = vmatpush3.bf16.msra.mxu1 %v2477_v35  ;;  %2455 = vmatprep.subr.bf16.mxu0 %v3173_v4  ;;  %p3073_p1 = pnand %p3072_p13, %p3066_p8 }
 0x18c   : > { %2479 = vmatprep.subr.bf16.mxu1 %v3173_v4 }
 0x18e   : > { %2457 = vmatpush3.bf16.msra.mxu0 %v2456_v39 }
 0x18f   : > { %2481 = vmatpush3.bf16.msra.mxu1 %v2480_v42  ;;  %2458 = vmatprep.subr.bf16.mxu0 %v3173_v4 }
 0x190   : > { %2482 = vmatprep.subr.bf16.mxu1 %v3173_v4 }
 0x192   : > { %2460 = vmatpush3.bf16.msra.mxu0 %v2459_v47  ;;  %v3177_v47 = vmov 0  }
 0x193   : > { %2484 = vmatpush3.bf16.msra.mxu1 %v2483_v48  ;;  %2461 = vmatprep.subr.bf16.mxu0 %v3173_v4  ;;  %v1003_v48 = vsel %vm905_vm2, 1, %v3177_v47 }
 0x194   : > { %2485 = vmatprep.subr.bf16.mxu1 %v3173_v4  ;;  %v3740_v49 = vrot.slane %v1003_v48, %v1006_v46 }
 0x196   : > { %2463 = vmatpush3.bf16.msra.mxu0 %v2462_v53  ;;  %vm1008_vm3 = vcmp.eq.s32.totalorder %v3740_v49, 1  ;;  %v920_v49 = vld [vmem:[#allocation19 + $0x70] sm:$0xff] }
 0x197   : > { %2487 = vmatpush3.bf16.msra.mxu1 %v2486_v54  ;;  %2488 = vmatprep.subr.bf16.mxu0 %v3173_v4 }
 0x198   : > { %2356 = vmatprep.subr.mxu1 %v3175_v41 }
 0x204   : > { %v598_v20 = vpop.xlane.xlu0 %597 }
 0x205   : > { %v600_v21 = vmul.f32 0.0078125, %v598_v20  ;;  %v823_v20 = vld [vmem:[#allocation16 + $0x60] sm:$0xff] }
 0x207   : > { %v3688_v22 = vsub.f32 %v3676_v0, %v600_v21  ;;  %v824_v21 = vld [vmem:[#allocation16 + $0x68] sm:$0xff] }
 0x209   : > { %v602_v23 = vmul.f32 %v3688_v22, %v3688_v22 }
 0x20b   : > { %603 = vadd.xlane.f32.xlu0 %v602_v23  ;;  %v825_v23 = vld [vmem:[#allocation16 + $0x70] sm:$0xff] }
 0x20c   : > { %v2510_v25 = vpack.c.bf16 %v826_v24, %v825_v23  ;;  %v912_v24 = vld [vmem:[#allocation19 + $0x30] sm:$0xff] }
 0x298   : > { %v604_v55 = vpop.xlane.xlu0 %603 }
 0x299   : > { %v605_v56 = vmul.f32 0.0078125, %v604_v55 }
 0x29b   : > { %v606_v57 = vadd.f32 1e-06, %v605_v56 }
 0x29d   : > { %2697 = vrsqrt.f32 %v606_v57 }
 0x2a7   : > { %v2698_v58 = vpop.eup %2697 }
 0x2a8   : > { %v608_v60 = vmul.f32 %v2698_v58, %v3688_v22  ;;  %v2507_v22 = vpack.c.bf16 %v824_v21, %v823_v20  ;;  %v911_v20 = vld [vmem:[#allocation19 + $0x28] sm:$0xff] }
 0x2aa   : > { %v616_v1 = vmul.f32 %v2138_v59, %v608_v60 }
 0x2ac   : > { %v624_v3 = vadd.f32 %v2139_v63, %v616_v1 }
 0x2ae   : > { %2284 = vmatmul.mubr.f32.vlgmr.msra.gmra.mrb[0].mxu0 %v624_v3  ;;  %2319 = vmatmul.mubr.f32.vlgmr.msra.gmra.mrb[0].mxu1 %v624_v3 }
 0x2af   : > { %2490 = vmatpush3.bf16.msra.mxu0 %v2489_v2  ;;  %2353 = vmatprep.mubr.msk.f32.mxu0 %vm3174_vm0, %v3175_v41 }
 0x2b0   : > { %2491 = vmatprep.subr.bf16.mxu0 %v3173_v4  ;;  %2358 = vmatprep.mubr.msk.f32.mxu1 %vm3174_vm0, %v3175_v41 }
 0x2b3   : > { %2493 = vmatpush3.bf16.msra.mxu0 %v2492_v7 }
 0x2b4   : > { %2494 = vmatprep.subr.bf16.mxu0 %v3173_v4 }
 0x2b7   : > { %2496 = vmatpush3.bf16.msra.mxu0 %v2495_v10 }
 0x2b8   : > { %2497 = vmatprep.subr.bf16.mxu0 %v3173_v4 }
 0x2bb   : > { %2499 = vmatpush3.bf16.msra.mxu0 %v2498_v13 }
 0x2bc   : > { %2500 = vmatprep.subr.bf16.mxu0 %v3173_v4 }
 0x2bf   : > { %2502 = vmatpush3.bf16.msra.mxu0 %v2501_v16 }
 0x2c0   : > { %2503 = vmatprep.subr.bf16.mxu0 %v3173_v4 }
 0x2c3   : > { %2505 = vmatpush3.bf16.msra.mxu0 %v2504_v19  ;;  %v910_v19 = vld [vmem:[#allocation19 + $0x20] sm:$0xff] }
 0x2c4   : > { %2506 = vmatprep.subr.bf16.mxu0 %v3173_v4 }
 0x2c7   : > { %2508 = vmatpush3.bf16.msra.mxu0 %v2507_v22  ;;  %v2513_v22 = vpack.c.bf16 %v911_v20, %v910_v19 }
 0x2c8   : > { %2509 = vmatprep.subr.bf16.mxu0 %v3173_v4 }
 0x2cb   : > { %2511 = vmatpush3.bf16.msra.mxu0 %v2510_v25  ;;  %v913_v25 = vld [vmem:[#allocation19 + $0x38] sm:$0xff] }
 0x2cc   : > { %2524 = vmatprep.subr.bf16.mxu0 %v3173_v4 }
 0x2ce   : > { %2354 = vmatmul.mubr.f32.vlgmr.msra.gmra.mrb[2].mxu0 %v624_v3 }
 0x2cf   : > { %2416 = vmatprep.mubr.msk.f32.mxu0 %vm3174_vm0, %v3175_v41 }
 0x381   : > { %v714_v27 = vpop.f32.mrb[0].mxu0  ;;  %v807_v28 = vpop.f32.mrb[0].mxu1 }
 0x382   : > { %v3721_v30 = vadd.f32 %v2141_v26, %v807_v28  ;;  %v2285_v31 = vpop.f32.mrb[1].mxu0  ;;  %v2320_v32 = vpop.f32.mrb[1].mxu1  ;;  %v3727_v33 = vadd.f32 %v2140_v29, %v714_v27  ;;  %v2516_v26 = vpack.c.bf16 %v913_v25, %v912_v24  ;;  %v906_v27 = vld [vmem:[#allocation19] sm:$0xff]  ;;  %v907_v28 = vld [vmem:[#allocation19 + $0x8] sm:$0xff] }
 0x383   : > { %v2519_v29 = vpack.c.bf16 %v907_v28, %v906_v27  ;;  %v908_v31 = vld [vmem:[#allocation19 + $0x10] sm:$0xff]  ;;  %v909_v32 = vld [vmem:[#allocation19 + $0x18] sm:$0xff]  ;;  %v919_v24 = vld [vmem:[#allocation19 + $0x68] sm:$0xff] }
 0x384   : > { %1097 = vrot.lane.b32.xlu0 %v3721_v30, %s3176_s1  ;;  %2357 = vmatpush3.xpose.msk.msra.mxu1 %vm922_vm1, %v3721_v30 }
 0x385   : > { %2361 = vmatprep.subr.mxu1 %v3175_v41 }
 0x387   : > { %2359 = vmatmul.mubr.msk.f32.vlgmr.msra.gmra.mrb[2].mxu1 %vm922_vm1, %v3727_v33 }
 0x388   : > { %2363 = vmatprep.mubr.msk.f32.mxu1 %vm3174_vm0, %v3175_v41 }
 0x3a1   : > { %v900_v35 = vpop.f32.mrb[2].mxu0 }
 0x3a2   : > { %v3734_v36 = vadd.f32 %v2142_v34, %v900_v35  ;;  %v2355_v37 = vpop.f32.mrb[3].mxu0 }
 0x3a3   : > { %v2522_v37 = vpack.c.bf16 %v909_v32, %v908_v31 }
 0x3a4   : > { %2362 = vmatpush3.msra.mxu1 %v3734_v36 }
 0x3a5   : > { %2366 = vmatprep.subr.mxu1 %v3175_v41 }
 0x3f6   : > { %v1098_v62 = vpop.permute.xlu0 %1097 }
 0x45a   : > { %v995_v39 = vpop.f32.mrb[2].mxu1 }
 0x45b   : > { %v999_v40 = vmul.f32 0.17677669, %v995_v39  ;;  %v2360_v42 = vpop.f32.mrb[3].mxu1 }
 0x45d   : > { %v1000_v44 = vmul.f32 0.033333335, %v999_v40 }
 0x45f   : > { %2699 = vtanh.f32 %v1000_v44 }
 0x469   : > { %v2700_v50 = vpop.eup %2699 }
 0x46a   : > { %v1002_v51 = vmul.f32 30.0, %v2700_v50 }
 0x46c   : > { %v1009_v52 = vsel %vm1008_vm3, -inf, %v1002_v51 }
 0x46d   : > { %v1011_v53 = vsel %vm1010_vm4, %v1009_v52, -inf }
 0x46e   : > { %1012 = vmax.xlane.f32.xlu1 %v1011_v53 }
 0x4fb   : > { %v1013_v54 = vpop.xlane.xlu1 %1012 }
 0x4fc   : > { %v1014_v55 = vsub.f32 %v1009_v52, %v1013_v54 }
 0x4fe   : > { %v1015_v56 = vmul.f32 1.442695, %v1014_v55 }
 0x500   : > { %2701 = vpow2.f32 %v1015_v56 }
 0x50a   : > { %v2702_v57 = vpop.eup %2701 }
 0x50b   : > { %v1017_v58 = vsel %vm1010_vm4, %v2702_v57, 0.0 }
 0x50c   : > { %1018 = vadd.xlane.f32.xlu1 %v1017_v58 }
 0x51d   : > { %1095 = vrot.lane.b32.xlu1 %v3727_v33, %s3176_s1 }
 0x599   : > { %v1019_v59 = vpop.xlane.xlu1 %1018 }
 0x59a   : > { %2703 = vrcp.f32 %v1019_v59 }
 0x59d   : > { %v1096_v63 = vpop.permute.xlu1 %1095 }
 0x5a4   : > { %v2704_v60 = vpop.eup %2703 }
 0x5a5   : > { %v1021_v61 = vmul.f32 %v2704_v60, %v2702_v57  ;;  %v914_v60 = vld [vmem:[#allocation19 + $0x40] sm:$0xff] }
 0x5a7   : > { %2364 = vmatmul.mubr.msk.f32.vlgmr.msra.gmra.mrb[4].mxu1 %vm1010_vm4, %v1021_v61  ;;  %v915_v61 = vld [vmem:[#allocation19 + $0x48] sm:$0xff] }
 0x5a8   : > { %2367 = vmatpush3.xpose.msk.msra.mxu1 %vm922_vm1, %v1098_v62  ;;  %2368 = vmatprep.mubr.msk.f32.mxu1 %vm3174_vm0, %v3175_v41  ;;  %v916_v62 = vld [vmem:[#allocation19 + $0x50] sm:$0xff] }
 0x5a9   : > { %2371 = vmatprep.subr.mxu1 %v3175_v41 }
 0x5ab   : > { %2369 = vmatmul.mubr.msk.f32.vlgmr.msra.gmra.mrb[6].mxu1 %vm922_vm1, %v1096_v63  ;;  %v2525_v63 = vpack.c.bf16 %v915_v61, %v914_v60 }
 0x5ac   : > { %2373 = vmatprep.mubr.msk.f32.mxu1 %vm3174_vm0, %v3175_v41 }
 0x5ad   : > { %2526 = vmatpush3.bf16.msra.mxu0 %v2525_v63 }
 0x5ae   : > { %2527 = vmatprep.subr.bf16.mxu0 %v3173_v4 }
 0x67a   : > { %v1091_v1 = vpop.f32.mrb[4].mxu1 }
 0x67b   : > { %v2365_v2 = vpop.f32.mrb[5].mxu1 }
 0x67e   : > { %v1169_v3 = vpop.f32.mrb[6].mxu1 }
 0x67f   : > { %v1173_v5 = vmul.f32 0.17677669, %v1169_v3  ;;  %v2370_v6 = vpop.f32.mrb[7].mxu1 }
 0x681   : > { %v1174_v7 = vmul.f32 0.033333335, %v1173_v5 }
 0x683   : > { %2705 = vtanh.f32 %v1174_v7 }
 0x68d   : > { %v2706_v8 = vpop.eup %2705 }
 0x68e   : > { %v1176_v9 = vmul.f32 30.0, %v2706_v8 }
 0x690   : > { %v1177_v10 = vsel %vm1008_vm3, -inf, %v1176_v9 }
 0x691   : > { %v1178_v11 = vsel %vm1010_vm4, %v1177_v10, -inf }
 0x692   : > { %1179 = vmax.xlane.f32.xlu1 %v1178_v11 }
 0x6a3   : > { %1414 = vrot.lane.b32.xlu1 %v3721_v30, %s3178_s28 }
 0x6a7   : > { %1412 = vrot.lane.b32.xlu1 %v3727_v33, %s3178_s28 }
 0x71f   : > { %v1180_v12 = vpop.xlane.xlu1 %1179 }
 0x720   : > { %v1181_v13 = vsub.f32 %v1177_v10, %v1180_v12 }
 0x722   : > { %v1182_v14 = vmul.f32 1.442695, %v1181_v13 }
 0x723   : > { %v1415_v38 = vpop.permute.xlu1 %1414 }
 0x724   : > { %2707 = vpow2.f32 %v1182_v14 }
 0x727   : > { %v1413_v39 = vpop.permute.xlu1 %1412 }
 0x72e   : > { %v2708_v15 = vpop.eup %2707 }
 0x72f   : > { %v1184_v16 = vsel %vm1010_vm4, %v2708_v15, 0.0 }
 0x730   : > { %1185 = vadd.xlane.f32.xlu0 %v1184_v16 }
 0x746   : > { %1190 = vrot.lane.b32.xlu0 %v3734_v36, %s3176_s1 }
 0x7bd   : > { %v1186_v17 = vpop.xlane.xlu0 %1185 }
 0x7be   : > { %2709 = vrcp.f32 %v1186_v17 }
 0x7c1   : > { %v1191_v18 = vpop.permute.xlu0 %1190 }
 0x7c2   : > { %2372 = vmatpush3.msra.mxu1 %v1191_v18 }
 0x7c3   : > { %2512 = vmatprep.subr.bf16.mxu1 %v3173_v4 }
 0x7c8   : > { %v2710_v21 = vpop.eup %2709 }
 0x7c9   : > { %v1188_v23 = vmul.f32 %v2710_v21, %v2708_v15 }
 0x7cb   : > { %2374 = vmatmul.mubr.msk.f32.vlgmr.msra.gmra.mrb[8].mxu1 %vm1010_vm4, %v1188_v23  ;;  %v918_v23 = vld [vmem:[#allocation19 + $0x60] sm:$0xff] }
 0x7cc   : > { %2514 = vmatpush3.bf16.msra.mxu1 %v2513_v22  ;;  %2384 = vmatprep.mubr.msk.f32.mxu1 %vm3174_vm0, %v3175_v41  ;;  %v2531_v25 = vpack.c.bf16 %v919_v24, %v918_v23 }
 0x7cd   : > { %2515 = vmatprep.subr.bf16.mxu1 %v3173_v4 }
 0x7d0   : > { %2517 = vmatpush3.bf16.msra.mxu1 %v2516_v26  ;;  %v921_v26 = vld [vmem:[#allocation19 + $0x78] sm:$0xff] }
 0x7d1   : > { %2518 = vmatprep.subr.bf16.mxu1 %v3173_v4  ;;  %v2534_v28 = vpack.c.bf16 %v921_v26, %v920_v49 }
 0x89e   : > { %v1262_v34 = vpop.f32.mrb[8].mxu1 }
 0x89f   : > { %v2375_v35 = vpop.f32.mrb[9].mxu1  ;;  %2385 = vmatmul.mubr.msk.f32.vlgmr.msra.gmra.mrb[10].mxu1 %vm922_vm1, %v1262_v34 }
 0x8a0   : > { %2520 = vmatpush3.bf16.msra.mxu1 %v2519_v29  ;;  %2395 = vmatprep.mubr.msk.f32.mxu1 %vm3174_vm0, %v3175_v41 }
 0x8a1   : > { %2521 = vmatprep.subr.bf16.mxu1 %v3173_v4 }
 0x8a4   : > { %2523 = vmatpush3.bf16.msra.mxu1 %v2522_v37 }
 0x8a5   : > { %2398 = vmatprep.subr.mxu1 %v3175_v41 }
 0x8a7   : > { %2396 = vmatmul.mubr.msk.f32.vlgmr.msra.gmra.mrb[12].mxu1 %vm922_vm1, %v1091_v1  ;;  %v917_v1 = vld [vmem:[#allocation19 + $0x58] sm:$0xff] }
 0x8a8   : > { %2400 = vmatprep.mubr.msk.f32.mxu1 %vm3174_vm0, %v3175_v41 }
 0x8ad   : > { %2399 = vmatpush3.xpose.msk.msra.mxu1 %vm922_vm1, %v1415_v38 }
 0x8ae   : > { %2403 = vmatprep.subr.mxu1 %v3175_v41 }
 0x8b0   : > { %2401 = vmatmul.mubr.msk.f32.vlgmr.msra.gmra.mrb[14].mxu1 %vm922_vm1, %v1413_v39  ;;  %v2159_v39 = vld [vmem:[#allocation20] ss:$0 sm:$0xff] }
 0x8b1   : > { %2405 = vmatprep.mubr.msk.f32.mxu1 %vm3174_vm0, %v3175_v41 }
 0x972   : > { %v1335_v40 = vpop.f32.mrb[10].mxu1 }
 0x973   : > { %v2386_v42 = vpop.f32.mrb[11].mxu1 }
 0x97a   : > { %v1408_v43 = vpop.f32.mrb[12].mxu1 }
 0x97b   : > { %v3786_v44 = vadd.f32 %v1408_v43, %v1335_v40  ;;  %v2397_v45 = vpop.f32.mrb[13].mxu1 }
 0x983   : > { %v1486_v46 = vpop.f32.mrb[14].mxu1 }
 0x984   : > { %v1490_v47 = vmul.f32 0.17677669, %v1486_v46  ;;  %v2402_v48 = vpop.f32.mrb[15].mxu1 }
 0x986   : > { %v1491_v50 = vmul.f32 0.033333335, %v1490_v47 }
 0x988   : > { %2711 = vtanh.f32 %v1491_v50 }
 0x992   : > { %v2712_v51 = vpop.eup %2711 }
 0x993   : > { %v1493_v52 = vmul.f32 30.0, %v2712_v51 }
 0x995   : > { %v1494_v53 = vsel %vm1008_vm3, -inf, %v1493_v52 }
 0x996   : > { %v1495_v54 = vsel %vm1010_vm4, %v1494_v53, -inf }
 0x997   : > { %1496 = vmax.xlane.f32.xlu1 %v1495_v54 }
 0x9a8   : > { %1658 = vrot.lane.b32.xlu1 %v3721_v30, %s3179_s15  ;;  %v2528_v30 = vpack.c.bf16 %v917_v1, %v916_v62 }
 0x9aa   : > { %2529 = vmatpush3.bf16.msra.mxu0 %v2528_v30 }
 0x9ab   : > { %2530 = vmatprep.subr.bf16.mxu0 %v3173_v4 }
 0x9ac   : > { %1656 = vrot.lane.b32.xlu1 %v3727_v33, %s3179_s15 }
 0xa24   : > { %v1497_v55 = vpop.xlane.xlu1 %1496 }
 0xa25   : > { %v1498_v56 = vsub.f32 %v1494_v53, %v1497_v55 }
 0xa27   : > { %v1499_v57 = vmul.f32 1.442695, %v1498_v56 }
 0xa28   : > { %v1659_v5 = vpop.permute.xlu1 %1658 }
 0xa29   : > { %2713 = vpow2.f32 %v1499_v57 }
 0xa2c   : > { %v1657_v7 = vpop.permute.xlu1 %1656 }
 0xa33   : > { %v2714_v58 = vpop.eup %2713 }
 0xa34   : > { %v1501_v59 = vsel %vm1010_vm4, %v2714_v58, 0.0 }
 0xa35   : > { %1502 = vadd.xlane.f32.xlu0 %v1501_v59 }
 0xa4b   : > { %1506 = vrot.lane.b32.xlu0 %v3734_v36, %s3178_s28 }
 0xac2   : > { %v1503_v33 = vpop.xlane.xlu0 %1502 }
 0xac3   : > { %2715 = vrcp.f32 %v1503_v33 }
 0xac6   : > { %v1507_v2 = vpop.permute.xlu0 %1506 }
 0xac7   : > { %2404 = vmatpush3.msra.mxu1 %v1507_v2 }
 0xac8   : > { %2419 = vmatprep.subr.mxu1 %v3175_v41 }
 0xacd   : > { %v2716_v3 = vpop.eup %2715 }
 0xace   : > { %v1505_v6 = vmul.f32 %v2716_v3, %v2714_v58 }
 0xad0   : > { %2406 = vmatmul.mubr.msk.f32.vlgmr.msra.gmra.mrb[16].mxu1 %vm1010_vm4, %v1505_v6 }
 0xad1   : > { %2420 = vmatpush3.xpose.msk.msra.mxu1 %vm922_vm1, %v1659_v5  ;;  %2421 = vmatprep.mubr.msk.f32.mxu1 %vm3174_vm0, %v3175_v41 }
 0xad2   : > { %2424 = vmatprep.subr.mxu1 %v3175_v41 }
 0xad4   : > { %2422 = vmatmul.mubr.msk.f32.vlgmr.msra.gmra.mrb[18].mxu1 %vm922_vm1, %v1657_v7 }
 0xad5   : > { %2426 = vmatprep.mubr.msk.f32.mxu1 %vm3174_vm0, %v3175_v41 }
 0xba3   : > { %v1578_v8 = vpop.f32.mrb[16].mxu1 }
 0xba4   : > { %v2407_v9 = vpop.f32.mrb[17].mxu1  ;;  %2417 = vmatmul.mubr.msk.f32.vlgmr.msra.gmra.mrb[4].mxu0 %vm922_vm1, %v1578_v8 }
 0xba5   : > { %2437 = vmatprep.mubr.msk.f32.mxu0 %vm3174_vm0, %v3175_v41  ;;  %2532 = vmatpush3.bf16.msra.mxu0 %v2531_v25 }
 0xba6   : > { %2533 = vmatprep.subr.bf16.mxu0 %v3173_v4 }
 0xba7   : > { %v1730_v10 = vpop.f32.mrb[18].mxu1 }
 0xba8   : > { %v1734_v11 = vmul.f32 0.17677669, %v1730_v10  ;;  %v2423_v12 = vpop.f32.mrb[19].mxu1 }
 0xba9   : > { %2535 = vmatpush3.bf16.msra.mxu0 %v2534_v28 }
 0xbaa   : > { %v1735_v13 = vmul.f32 0.033333335, %v1734_v11 }
 0xbac   : > { %2717 = vtanh.f32 %v1735_v13 }
 0xbb6   : > { %v2718_v14 = vpop.eup %2717 }
 0xbb7   : > { %v1737_v15 = vmul.f32 30.0, %v2718_v14 }
 0xbb9   : > { %v1738_v16 = vsel %vm1008_vm3, -inf, %v1737_v15 }
 0xbba   : > { %v1739_v17 = vsel %vm1010_vm4, %v1738_v16, -inf }
 0xbbb   : > { %1740 = vmax.xlane.f32.xlu0 %v1739_v17 }
 0xbd1   : > { %1750 = vrot.lane.b32.xlu0 %v3734_v36, %s3179_s15 }
 0xc48   : > { %v1741_v18 = vpop.xlane.xlu0 %1740 }
 0xc49   : > { %v1742_v19 = vsub.f32 %v1738_v16, %v1741_v18 }
 0xc4b   : > { %v1743_v20 = vmul.f32 1.442695, %v1742_v19 }
 0xc4c   : > { %v1751_v41 = vpop.permute.xlu0 %1750 }
 0xc4d   : > { %2719 = vpow2.f32 %v1743_v20  ;;  %2425 = vmatpush3.msra.mxu1 %v1751_v41 }
 0xc57   : > { %v2720_v21 = vpop.eup %2719 }
 0xc58   : > { %v1745_v22 = vsel %vm1010_vm4, %v2720_v21, 0.0 }
 0xc59   : > { %1746 = vadd.xlane.f32.xlu1 %v1745_v22 }
 0xc77   : > { %v1651_v27 = vpop.f32.mrb[4].mxu0 }
 0xc78   : > { %v1655_v36 = vadd.f32 %v1651_v27, %v3786_v44  ;;  %v2418_v29 = vpop.f32.mrb[5].mxu0 }
 0xce6   : > { %v1747_v31 = vpop.xlane.xlu1 %1746 }
 0xce7   : > { %2721 = vrcp.f32 %v1747_v31 }
 0xcf1   : > { %v2722_v32 = vpop.eup %2721 }
 0xcf2   : > { %v1749_v34 = vmul.f32 %v2722_v32, %v2720_v21 }
 0xcf4   : > { %2427 = vmatmul.mubr.msk.f32.vlgmr.msra.gmra.mrb[20].mxu1 %vm1010_vm4, %v1749_v34 }
 0xdc7   : > { %v1822_v35 = vpop.f32.mrb[20].mxu1 }
 0xdc8   : > { %v2428_v37 = vpop.f32.mrb[21].mxu1  ;;  %2438 = vmatmul.mubr.msk.f32.vlgmr.msra.gmra.mrb[6].mxu0 %vm922_vm1, %v1822_v35 }
 0xe9b   : > { %v1895_v38 = vpop.f32.mrb[6].mxu0 }
 0xe9c   : > { %v1899_v40 = vadd.f32 %v1895_v38, %v1655_v36  ;;  %v2439_v42 = vpop.f32.mrb[7].mxu0 }
 0xe9e   : > { %v1907_v4 = vadd.f32 %v2159_v39, %v1899_v40 }
 0xea0   : > { %v1908_v43 = vadd.f32 %v1907_v4, %v3676_v0 }
 0xea2   : > { %1909 = vst [vmem:[%s595_s25] sm:$0xff] %v1908_v43 }
 0xea3   : > { %3076 = shalt.err (!%p3073_p1)
}
 0xea4   : > { %s3077_s3 = scalar_lea.hbm %s3829_s0, 128  ;;  %s3081_s15 = scalar_lea.hbm %s3932_s19, 256 }
 0xea5   : > { %p3078_p3 = scmp.ne.s32.totalorder %s3829_s0, %s3077_s3  ;;  %p3082_p11 = scmp.lt.u32.totalorder %s3829_s0, %s3932_s19 }
 0xea6   : > { %p3083_p5 = scmp.lt.u32.totalorder %s3081_s15, %s3077_s3  ;;  %p3085_p0 = scmp.lt.u32.totalorder %s3077_s3, %s3829_s0 }
 0xea7   : > { %p3079_p2 = pnand %p3078_p3, %p3933_p6 }
 0xea8   : > { %p3084_p7 = por %p3083_p5, %p3082_p11 }
 0xea9   : > { %p3080_p10 = pneg %p3079_p2 }
 0xeaa   : > { %p3086_p12 = por %p3085_p0, %p3084_p7 }
 0xeac   : > { %p3087_p8 = pnand %p3086_p12, %p3080_p10 }
 0xeae   : > { %3090 = shalt.err (!%p3087_p8)
}
 0xeaf   : > { %2580 = dma.vmem_to_hbm [thread:$0]  (%p3933_p6), %s3831_s20, 128, %s3829_s0, %s1911_s16  }
 0xeb0 PF: > { %s1936_s30 = sand.u32 1, %s3145_s21   ;;  %p3934_p9 = scmp.ne.s32.totalorder %s3912_s18, 0 }
 0xeb1   : > { %p3935_p4 = scmp.ge.s32.totalorder %s3157_s24, 2  ;;  %s1937_s5 = scalar_lea.sflag [#allocation4], %s1936_s30 }
 0xeb3   : > { %p2621_p13 = pnand %p3935_p4, %p3934_p9 }
 0xeb5   : > { %3140 = dma.done.wait (!%p2621_p13), %s1937_s5, 128  }
 0xeb6   : > { %3142 = vsyncadd (!%p2621_p13), %s1937_s5, 4294967168  ;;  %p33_p1 = scmp.ge.s32.totalorder %s3527_s13, 4   ;;  %s3936_s21 = smov %s3149_s22 }
 0xeb7   : > { %s3937_s22 = smov %s3153_s23  ;;  %s3938_s23 = smov %s3538_s14 }
 0xeb8   : > { %s3939_s24 = smov %s3527_s13  ;;  %35 = sbr.rel (!%p33_p1) target bundleno = 20 (0x14), region = 166 }
 0xebf   :  { %1942 = vsyncpa [#allocation3], 1 }
 0xec0   :  { %1944 = vsyncpa [#allocation3 + $0x1], 1 }
 0xec1   :  { %1945 = vsyncpa [#allocation6], 1 }
 0xec2   :  { %1947 = vsyncpa [#allocation6 + $0x1], 1 }
 0xec3   :  { %1948 = vsyncpa [#allocation9], 1 }
 0xec4   :  { %1949 = vsyncpa [#allocation12], 1 }
 0xec5   :  { %1950 = vsyncpa [#allocation15], 1 }
 0xec6   :  { %1951 = vsyncpa [#allocation18], 1 }
 0xec7   :  { %1952 = vsyncpa [#allocation21], 1 }
 0xec8   :  { %1953 = vsyncpa [#allocation4], 1 }
 0xec9   :  { %1955 = vsyncpa [#allocation4 + $0x1], 1 }

</bundles_post_ra>
